<compile_context>
chip_gen: v5e
topology: v5e:2x2
jax: 0.10.0
libtpu: 0.0.40
codegen_flags: <defaults>
</compile_context>

<pallas_src>
import functools

import jax
import jax.numpy as jnp
from jax.experimental import pallas as pl
from jax.experimental.pallas import tpu as pltpu

MAX_VOCAB = 5000
H1 = 64
H2 = 128
OUT = 2
OUT_PAD = 128          # lane-dense output block; real logits live in columns [:OUT]
BT_MAX = 1024          # max batch tile (v7x VMEM safe with the 48 MiB clamp below)


def _round_up(a, m):
    return (a + m - 1) // m * m


def _cdiv(a, b):
    return (a + b - 1) // b


def _choose_bt(B):
    """Batch tile: multiple of 16 (bf16 sublane quantum), minimal ragged padding,
    and >= 2 grid steps when B is large enough (megacore sharding on v7x)."""
    n_tiles = max(_cdiv(B, BT_MAX), 1)
    if B >= 2 * 16:
        n_tiles = max(n_tiles, 2)
    return _round_up(_cdiv(B, n_tiles), 16)


def mlp_kernel(x_ref, w1_ref, b1_ref, w2_ref, b2_ref, w3_ref, b3_ref, o_ref):
    # Layer 1: bf16 x @ bf16 W1 on the MXU with f32 accumulation; bias/ReLU in f32.
    h1 = jnp.dot(x_ref[...], w1_ref[...], preferred_element_type=jnp.float32)
    h1 = jnp.maximum(h1 + b1_ref[...], 0.0)
    # Layer 2: Linear(64,128) in f32.
    # TODO(synk): Dropout(0.3) is identity in eval/inference mode; training-mode
    # dropout (pltpu.prng_random_bits mask + 1/(1-p) scale) not implemented here.
    h2 = jnp.dot(h1, w2_ref[...], preferred_element_type=jnp.float32)
    h2 = jnp.maximum(h2 + b2_ref[...], 0.0)
    # Layer 3: Linear(128, 2), padded to 128 output lanes for an unmasked store.
    o_ref[...] = jnp.dot(h2, w3_ref[...], preferred_element_type=jnp.float32) + b3_ref[...]


def prepare_params(params):
    """One-time parameter prep (do NOT call per forward): bf16 W1, lane-padded W3/b3."""
    w1, b1, w2, b2, w3, b3 = params
    w1_bf = jnp.asarray(w1, jnp.float32).astype(jnp.bfloat16)          # (5000, 64) bf16
    w3_p = jnp.zeros((H2, OUT_PAD), jnp.float32).at[:, :OUT].set(w3)   # (128, 128)
    b3_p = jnp.zeros((1, OUT_PAD), jnp.float32).at[:, :OUT].set(jnp.reshape(b3, (1, OUT)))
    return (w1_bf,
            jnp.reshape(b1, (1, H1)).astype(jnp.float32),
            jnp.asarray(w2, jnp.float32),
            jnp.reshape(b2, (1, H2)).astype(jnp.float32),
            w3_p, b3_p)


@functools.partial(jax.jit, static_argnames=())
def _forward_impl(x, prepped):
    w1_bf, b1, w2, b2, w3_p, b3_p = prepped
    B = x.shape[0]
    x = x.reshape(B, -1)                              # nn.Flatten()
    assert x.shape[1] == MAX_VOCAB, f"expected flattened dim {MAX_VOCAB}, got {x.shape[1]}"

    # Cast FIRST (halves any padding/copy traffic), then pad only the batch dim if needed.
    x_b = x.astype(jnp.bfloat16)
    bt = _choose_bt(B)
    B_pad = _round_up(B, bt)
    if B_pad != B:
        x_b = jnp.pad(x_b, ((0, B_pad - B), (0, 0)))
    grid = (B_pad // bt,)

    # VMEM budget: double-buffered x/out tiles (lanes padded to 5120 inside VMEM)
    # + resident weights + headroom; clamp to 48 MiB (v7x 64 MiB/TC safe).
    k_vmem = _round_up(MAX_VOCAB, 128)
    vmem_bytes = (2 * (bt * k_vmem * 2 + bt * OUT_PAD * 4)
                  + 2 * (k_vmem * H1 * 2 + H1 * H2 * 4 + H2 * OUT_PAD * 4
                         + (H1 + H2 + OUT_PAD) * 4)
                  + (6 << 20))
    vmem_bytes = int(min(max(vmem_bytes, 16 << 20), 48 << 20))

    out = pl.pallas_call(
        mlp_kernel,
        out_shape=jax.ShapeDtypeStruct((B_pad, OUT_PAD), jnp.float32),
        grid=grid,
        in_specs=[
            pl.BlockSpec((bt, MAX_VOCAB), lambda i: (i, 0)),   # x: streamed per batch tile
            pl.BlockSpec((MAX_VOCAB, H1), lambda i: (0, 0)),   # weights/biases: resident
            pl.BlockSpec((1, H1), lambda i: (0, 0)),
            pl.BlockSpec((H1, H2), lambda i: (0, 0)),
            pl.BlockSpec((1, H2), lambda i: (0, 0)),
            pl.BlockSpec((H2, OUT_PAD), lambda i: (0, 0)),
            pl.BlockSpec((1, OUT_PAD), lambda i: (0, 0)),
        ],
        out_specs=pl.BlockSpec((bt, OUT_PAD), lambda i: (i, 0)),
        compiler_params=pltpu.CompilerParams(
            dimension_semantics=("parallel",),                 # shard batch tiles across TCs
            vmem_limit_bytes=vmem_bytes,
        ),
    )(x_b, w1_bf, b1, w2, b2, w3_p, b3_p)

    return out[:B, :OUT]


def neural_network_forward(x, params, *, prepped=None):
    """Forward pass. Pass `prepped=prepare_params(params)` to avoid per-call prep."""
    if prepped is None:
        prepped = prepare_params(params)
    return _forward_impl(x, prepped)


def init_params(key):
    """Deterministic init mimicking PyTorch's U(-1/sqrt(fan_in), 1/sqrt(fan_in))."""
    ks = jax.random.split(key, 6)

    def lin(kw, kb, fan_in, fan_out):
        bound = 1.0 / jnp.sqrt(jnp.float32(fan_in))
        w = jax.random.uniform(kw, (fan_in, fan_out), jnp.float32, -bound, bound)
        b = jax.random.uniform(kb, (1, fan_out), jnp.float32, -bound, bound)
        return w, b

    w1, b1 = lin(ks[0], ks[1], MAX_VOCAB, H1)
    w2, b2 = lin(ks[2], ks[3], H1, H2)
    w3, b3 = lin(ks[4], ks[5], H2, OUT)
    return (w1, b1, w2, b2, w3, b3)


def reference_forward_matched(x, params):
    """Pure-JAX reference with the same bf16 layer-1 numerics as the kernel."""
    w1, b1, w2, b2, w3, b3 = params
    x = x.reshape(x.shape[0], -1)
    h1 = jnp.dot(x.astype(jnp.bfloat16), w1.astype(jnp.bfloat16),
                 preferred_element_type=jnp.float32) + b1
    h1 = jnp.maximum(h1, 0.0)
    h2 = jnp.maximum(h1 @ w2 + b2, 0.0)      # dropout = identity (eval)
    return h2 @ w3 + b3


def reference_forward_f32(x, params):
    """Full-f32 reference matching the PyTorch module semantics (eval mode)."""
    w1, b1, w2, b2, w3, b3 = params
    x = x.reshape(x.shape[0], -1)
    h1 = jnp.maximum(x @ w1 + b1, 0.0)
    h2 = jnp.maximum(h1 @ w2 + b2, 0.0)
    return h2 @ w3 + b3


if __name__ == "__main__":
    key = jax.random.PRNGKey(0)
    k_x, k_p = jax.random.split(key)

    B = 2
    x = jax.random.normal(k_x, (B, MAX_VOCAB), dtype=jnp.float32)
    params = init_params(k_p)

    # One-time parameter prep (hoisted out of the per-call path).
    prepped = jax.block_until_ready(prepare_params(params))

    logits = jax.block_until_ready(neural_network_forward(x, params, prepped=prepped))
    assert logits.shape == (B, OUT) and logits.dtype == jnp.float32

    ref_matched = reference_forward_matched(x, params)
    assert jnp.allclose(logits, ref_matched, atol=2e-3, rtol=2e-3), \
        "mismatch vs bf16-matched JAX reference"

    ref_f32 = reference_forward_f32(x, params)
    assert jnp.allclose(logits, ref_f32, atol=3e-2, rtol=3e-2), \
        "mismatch vs full-f32 JAX reference"

    print("KERNEL_OK")
</pallas_src>

<mosaic_0001>
module attributes {stable_mosaic.version = 11 : i64} {
  func.func @mlp_kernel(%arg0: i32, %arg1: memref<16x5000xbf16, #tpu.memory_space<vmem>>, %arg2: memref<5000x64xbf16, #tpu.memory_space<vmem>>, %arg3: memref<1x64xf32, #tpu.memory_space<vmem>>, %arg4: memref<64x128xf32, #tpu.memory_space<vmem>>, %arg5: memref<1x128xf32, #tpu.memory_space<vmem>>, %arg6: memref<128x128xf32, #tpu.memory_space<vmem>>, %arg7: memref<1x128xf32, #tpu.memory_space<vmem>>, %arg8: memref<16x128xf32, #tpu.memory_space<vmem>>) attributes {dimension_semantics = [#tpu.dimension_semantics<parallel>], iteration_bounds = array<i64: 1>, scalar_prefetch = 0 : i64, scratch_operands = 0 : i64, tpu.core_type = #tpu.core_type<tc>, window_params = [{transform_indices = @transform_0, window_bounds = array<i64: 16, 5000>}, {pipeline_mode = #tpu.pipeline_mode<synchronous>, transform_indices = @transform_1, window_bounds = array<i64: 5000, 64>}, {pipeline_mode = #tpu.pipeline_mode<synchronous>, transform_indices = @transform_2, window_bounds = array<i64: 1, 64>}, {pipeline_mode = #tpu.pipeline_mode<synchronous>, transform_indices = @transform_3, window_bounds = array<i64: 64, 128>}, {pipeline_mode = #tpu.pipeline_mode<synchronous>, transform_indices = @transform_4, window_bounds = array<i64: 1, 128>}, {pipeline_mode = #tpu.pipeline_mode<synchronous>, transform_indices = @transform_5, window_bounds = array<i64: 128, 128>}, {pipeline_mode = #tpu.pipeline_mode<synchronous>, transform_indices = @transform_6, window_bounds = array<i64: 1, 128>}, {transform_indices = @transform_7, window_bounds = array<i64: 16, 128>}]} {
    %c0 = arith.constant 0 : index
    %c0_0 = arith.constant 0 : index
    %0 = vector.load %arg1[%c0, %c0_0] : memref<16x5000xbf16, #tpu.memory_space<vmem>>, vector<16x5000xbf16>
    %c0_1 = arith.constant 0 : index
    %c0_2 = arith.constant 0 : index
    %1 = vector.load %arg2[%c0_1, %c0_2] : memref<5000x64xbf16, #tpu.memory_space<vmem>>, vector<5000x64xbf16>
    %cst = arith.constant dense<0.000000e+00> : vector<16x64xf32>
    %2 = tpu.matmul %0, %1, %cst {dimension_numbers = #tpu.dot_dimension_numbers<[1], [0], [0], [1], [0, 0, 1, 1], [], []>} : vector<16x5000xbf16>, vector<5000x64xbf16>, vector<16x64xf32> -> vector<16x64xf32>
    %c0_3 = arith.constant 0 : index
    %c0_4 = arith.constant 0 : index
    %3 = vector.load %arg3[%c0_3, %c0_4] : memref<1x64xf32, #tpu.memory_space<vmem>>, vector<1x64xf32>
    %4 = vector.broadcast %3 : vector<1x64xf32> to vector<16x64xf32>
    %5 = arith.addf %2, %4 : vector<16x64xf32>
    %cst_5 = arith.constant 0.000000e+00 : f32
    %6 = vector.broadcast %cst_5 : f32 to vector<16x64xf32>
    %7 = arith.maximumf %5, %6 : vector<16x64xf32>
    %c0_6 = arith.constant 0 : index
    %c0_7 = arith.constant 0 : index
    %8 = vector.load %arg4[%c0_6, %c0_7] : memref<64x128xf32, #tpu.memory_space<vmem>>, vector<64x128xf32>
    %cst_8 = arith.constant dense<0.000000e+00> : vector<16x128xf32>
    %9 = tpu.matmul %7, %8, %cst_8 {dimension_numbers = #tpu.dot_dimension_numbers<[1], [0], [0], [1], [0, 0, 1, 1], [], []>} : vector<16x64xf32>, vector<64x128xf32>, vector<16x128xf32> -> vector<16x128xf32>
    %c0_9 = arith.constant 0 : index
    %c0_10 = arith.constant 0 : index
    %10 = vector.load %arg5[%c0_9, %c0_10] : memref<1x128xf32, #tpu.memory_space<vmem>>, vector<1x128xf32>
    %11 = vector.broadcast %10 : vector<1x128xf32> to vector<16x128xf32>
    %12 = arith.addf %9, %11 : vector<16x128xf32>
    %cst_11 = arith.constant 0.000000e+00 : f32
    %13 = vector.broadcast %cst_11 : f32 to vector<16x128xf32>
    %14 = arith.maximumf %12, %13 : vector<16x128xf32>
    %c0_12 = arith.constant 0 : index
    %c0_13 = arith.constant 0 : index
    %15 = vector.load %arg6[%c0_12, %c0_13] : memref<128x128xf32, #tpu.memory_space<vmem>>, vector<128x128xf32>
    %cst_14 = arith.constant dense<0.000000e+00> : vector<16x128xf32>
    %16 = tpu.matmul %14, %15, %cst_14 {dimension_numbers = #tpu.dot_dimension_numbers<[1], [0], [0], [1], [0, 0, 1, 1], [], []>} : vector<16x128xf32>, vector<128x128xf32>, vector<16x128xf32> -> vector<16x128xf32>
    %c0_15 = arith.constant 0 : index
    %c0_16 = arith.constant 0 : index
    %17 = vector.load %arg7[%c0_15, %c0_16] : memref<1x128xf32, #tpu.memory_space<vmem>>, vector<1x128xf32>
    %18 = vector.broadcast %17 : vector<1x128xf32> to vector<16x128xf32>
    %19 = arith.addf %16, %18 : vector<16x128xf32>
    %c0_17 = arith.constant 0 : index
    %c0_18 = arith.constant 0 : index
    %20 = vector.load %arg8[%c0_17, %c0_18] : memref<16x128xf32, #tpu.memory_space<vmem>>, vector<16x128xf32>
    tpu.vector_store %arg8[%c0_17, %c0_18], %19 {strides = array<i32>} : memref<16x128xf32, #tpu.memory_space<vmem>>, vector<16x128xf32>,
    return
  }
  func.func @transform_0(%arg0: i32) -> (i32, i32) {
    %c0_i32 = arith.constant 0 : i32
    %c0_i32_0 = arith.constant 0 : i32
    return %arg0, %c0_i32 : i32, i32
  }
  func.func @transform_1(%arg0: i32) -> (i32, i32) {
    %c0_i32 = arith.constant 0 : i32
    %c0_i32_0 = arith.constant 0 : i32
    %c0_i32_1 = arith.constant 0 : i32
    return %c0_i32, %c0_i32_0 : i32, i32
  }
  func.func @transform_2(%arg0: i32) -> (i32, i32) {
    %c0_i32 = arith.constant 0 : i32
    %c0_i32_0 = arith.constant 0 : i32
    %c0_i32_1 = arith.constant 0 : i32
    return %c0_i32, %c0_i32_0 : i32, i32
  }
  func.func @transform_3(%arg0: i32) -> (i32, i32) {
    %c0_i32 = arith.constant 0 : i32
    %c0_i32_0 = arith.constant 0 : i32
    %c0_i32_1 = arith.constant 0 : i32
    return %c0_i32, %c0_i32_0 : i32, i32
  }
  func.func @transform_4(%arg0: i32) -> (i32, i32) {
    %c0_i32 = arith.constant 0 : i32
    %c0_i32_0 = arith.constant 0 : i32
    %c0_i32_1 = arith.constant 0 : i32
    return %c0_i32, %c0_i32_0 : i32, i32
  }
  func.func @transform_5(%arg0: i32) -> (i32, i32) {
    %c0_i32 = arith.constant 0 : i32
    %c0_i32_0 = arith.constant 0 : i32
    %c0_i32_1 = arith.constant 0 : i32
    return %c0_i32, %c0_i32_0 : i32, i32
  }
  func.func @transform_6(%arg0: i32) -> (i32, i32) {
    %c0_i32 = arith.constant 0 : i32
    %c0_i32_0 = arith.constant 0 : i32
    %c0_i32_1 = arith.constant 0 : i32
    return %c0_i32, %c0_i32_0 : i32, i32
  }
  func.func @transform_7(%arg0: i32) -> (i32, i32) {
    %c0_i32 = arith.constant 0 : i32
    %c0_i32_0 = arith.constant 0 : i32
    return %arg0, %c0_i32 : i32, i32
  }
}

</mosaic_0001>

<bundles_post_ra>
// kernel: _forward_impl.1
= control target key start
LH: loop header
LB: loop body
LE: loop exit
PB: predicated region body
PF: predicated region fallthrough
CT: control target
= control target key end

     0   :  { %vm2774_vm0 = vcmask 1043456   ;;  %vm2770_vm1 = vcmask 64512   ;;  %vm3352_vm2 = vcmask 523264   ;;  %s6532_s1 = inlined_call_operand.vmem [shape: bf16[5000,64], index: 1, kind: input, shape index: {}]   ;;  %s6533_s0 = inlined_call_operand.vmem [shape: bf16[16,5000], index: 0, kind: input, shape index: {}]   ;;  %s6534_s2 = inlined_call_operand.vmem [shape: f32[1,64], index: 2, kind: input, shape index: {}]   ;;  %s6535_s4 = inlined_call_operand.vmem [shape: f32[1,128], index: 4, kind: input, shape index: {}]   ;;  %s6536_s3 = inlined_call_operand.vmem [shape: f32[64,128], index: 3, kind: input, shape index: {}]   ;;  %s6537_s5 = inlined_call_operand.vmem [shape: f32[128,128], index: 5, kind: input, shape index: {}]   ;;  %s6538_s6 = inlined_call_operand.vmem [shape: f32[1,128], index: 6, kind: input, shape index: {}]   ;;  %s6539_s7 = inlined_call_operand.vmem [shape: f32[16,128], index: 7, kind: output, shape index: {}]  }
   0x1   :  { %v4891_v0 = vld [vmem:[%s6532_s1 + $0x38] sm:$0xff]  ;;  %v4890_v4 = vld [vmem:[%s6532_s1 + $0x30] sm:$0xff]  ;;  %v4889_v8 = vld [vmem:[%s6532_s1 + $0x28] sm:$0xff] }
   0x2   :  { %v4899_v1 = vld [vmem:[%s6532_s1 + $0x78] sm:$0xff]  ;;  %2778 = vmatpush.bf16.msra.mxu0 %v4891_v0  ;;  %v4898_v5 = vld [vmem:[%s6532_s1 + $0x70] sm:$0xff]  ;;  %v4897_v9 = vld [vmem:[%s6532_s1 + $0x68] sm:$0xff] }
   0x3   :  { %v4907_v2 = vld [vmem:[%s6532_s1 + $0xb8] sm:$0xff]  ;;  %2792 = vmatpush.bf16.msra.mxu1 %v4899_v1  ;;  %v4906_v6 = vld [vmem:[%s6532_s1 + $0xb0] sm:$0xff]  ;;  %v4905_v10 = vld [vmem:[%s6532_s1 + $0xa8] sm:$0xff] }
   0x4   :  { %v4915_v3 = vld [vmem:[%s6532_s1 + $0xf8] sm:$0xff]  ;;  %2806 = vmatpush.bf16.msra.mxu2 %v4907_v2  ;;  %v4914_v7 = vld [vmem:[%s6532_s1 + $0xf0] sm:$0xff]  ;;  %v4913_v11 = vld [vmem:[%s6532_s1 + $0xe8] sm:$0xff] }
   0x5   :  { %2820 = vmatpush.bf16.msra.mxu3 %v4915_v3  ;;  %v4888_v12 = vld [vmem:[%s6532_s1 + $0x20] sm:$0xff]  ;;  %v4887_v16 = vld [vmem:[%s6532_s1 + $0x18] sm:$0xff]  ;;  %v4886_v20 = vld [vmem:[%s6532_s1 + $0x10] sm:$0xff] }
   0x6   :  { %2779 = vmatpush.bf16.msra.mxu0 %v4890_v4  ;;  %v4896_v13 = vld [vmem:[%s6532_s1 + $0x60] sm:$0xff]  ;;  %v4895_v17 = vld [vmem:[%s6532_s1 + $0x58] sm:$0xff]  ;;  %v4894_v21 = vld [vmem:[%s6532_s1 + $0x50] sm:$0xff] }
   0x7   :  { %2793 = vmatpush.bf16.msra.mxu1 %v4898_v5  ;;  %v4904_v14 = vld [vmem:[%s6532_s1 + $0xa0] sm:$0xff]  ;;  %v4903_v18 = vld [vmem:[%s6532_s1 + $0x98] sm:$0xff]  ;;  %v4902_v22 = vld [vmem:[%s6532_s1 + $0x90] sm:$0xff] }
   0x8   :  { %2807 = vmatpush.bf16.msra.mxu2 %v4906_v6  ;;  %v4912_v15 = vld [vmem:[%s6532_s1 + $0xe0] sm:$0xff]  ;;  %v4911_v19 = vld [vmem:[%s6532_s1 + $0xd8] sm:$0xff]  ;;  %v4910_v23 = vld [vmem:[%s6532_s1 + $0xd0] sm:$0xff] }
   0x9   :  { %2821 = vmatpush.bf16.msra.mxu3 %v4914_v7  ;;  %v4885_v24 = vld [vmem:[%s6532_s1 + $0x8] sm:$0xff]  ;;  %v4884_v28 = vld [vmem:[%s6532_s1] sm:$0xff]  ;;  %v4923_v31 = vld [vmem:[%s6532_s1 + $0x138] sm:$0xff] }
   0xa   :  { %2780 = vmatpush.bf16.msra.mxu0 %v4889_v8  ;;  %v4893_v25 = vld [vmem:[%s6532_s1 + $0x48] sm:$0xff]  ;;  %v4892_v29 = vld [vmem:[%s6532_s1 + $0x40] sm:$0xff]  ;;  %v4931_v34 = vld [vmem:[%s6532_s1 + $0x178] sm:$0xff] }
   0xb   :  { %2794 = vmatpush.bf16.msra.mxu1 %v4897_v9  ;;  %v4901_v26 = vld [vmem:[%s6532_s1 + $0x88] sm:$0xff]  ;;  %v4900_v30 = vld [vmem:[%s6532_s1 + $0x80] sm:$0xff]  ;;  %v4939_v37 = vld [vmem:[%s6532_s1 + $0x1b8] sm:$0xff] }
   0xc   :  { %2808 = vmatpush.bf16.msra.mxu2 %v4905_v10  ;;  %v4909_v27 = vld [vmem:[%s6532_s1 + $0xc8] sm:$0xff]  ;;  %v3435_v32 = vld [vmem:[%s6533_s0] sm:$0xf]  ;;  %v4844_v38 = vld [vmem:[%s6533_s0 + $0x4] sm:$0xf] }
   0xd   :  { %2822 = vmatpush.bf16.msra.mxu3 %v4913_v11  ;;  %v4864_v33 = vld [vmem:[%s6533_s0 + $0x9c] sm:$0xf0]  ;;  %v3443_v35 = vld [vmem:[%s6533_s0 + $0x8] sm:$0xf]  ;;  %v3437_v39 = vld [vmem:[%s6533_s0 + $0xa0] sm:$0xf0] }
   0xe   :  { %2781 = vmatpush.bf16.msra.mxu0 %v4888_v12  ;;  %v4865_v36 = vld [vmem:[%s6533_s0 + $0xa4] sm:$0xf0]  ;;  %v4908_v40 = vld [vmem:[%s6532_s1 + $0xc0] sm:$0xff]  ;;  %v3436_v41 = vor.u32 %v4864_v33, %v3435_v32  ;;  %v4947_v42 = vld [vmem:[%s6532_s1 + $0x1f8] sm:$0xff]  ;;  %v3440_v47 = vor.u32 %v4844_v38, %v3437_v39 }
   0xf   :  { %2795 = vmatpush.bf16.msra.mxu1 %v4896_v13  ;;  %v3444_v43 = vor.u32 %v4865_v36, %v3443_v35  ;;  %v4845_v44 = vld [vmem:[%s6533_s0 + $0xc] sm:$0xf]  ;;  %v4922_v46 = vld [vmem:[%s6532_s1 + $0x130] sm:$0xff]  ;;  %v4920_v56 = vld [vmem:[%s6532_s1 + $0x120] sm:$0xff] }
  0x10   :  { %2809 = vmatpush.bf16.msra.mxu2 %v4904_v14  ;;  %v3445_v45 = vld [vmem:[%s6533_s0 + $0xa8] sm:$0xf0]  ;;  %v4930_v48 = vld [vmem:[%s6532_s1 + $0x170] sm:$0xff]  ;;  %v4928_v57 = vld [vmem:[%s6532_s1 + $0x160] sm:$0xff] }
  0x11   :  { %2823 = vmatpush.bf16.msra.mxu3 %v4912_v15  ;;  %v4938_v49 = vld [vmem:[%s6532_s1 + $0x1b0] sm:$0xff]  ;;  %v3448_v50 = vor.u32 %v4845_v44, %v3445_v45  ;;  %v4921_v52 = vld [vmem:[%s6532_s1 + $0x128] sm:$0xff]  ;;  %v4936_v58 = vld [vmem:[%s6532_s1 + $0x1a0] sm:$0xff] }
  0x12   :  { %2782 = vmatpush.bf16.msra.mxu0 %v4887_v16  ;;  %v4946_v51 = vld [vmem:[%s6532_s1 + $0x1f0] sm:$0xff]  ;;  %v4929_v53 = vld [vmem:[%s6532_s1 + $0x168] sm:$0xff]  ;;  %v4944_v59 = vld [vmem:[%s6532_s1 + $0x1e0] sm:$0xff] }
  0x13   :  { %2796 = vmatpush.bf16.msra.mxu1 %v4895_v17  ;;  %v4937_v54 = vld [vmem:[%s6532_s1 + $0x1a8] sm:$0xff]  ;;  %v4919_v60 = vld [vmem:[%s6532_s1 + $0x118] sm:$0xff]  ;;  %v4918_v0 = vld [vmem:[%s6532_s1 + $0x110] sm:$0xff] }
  0x14   :  { %2810 = vmatpush.bf16.msra.mxu2 %v4903_v18  ;;  %v4945_v55 = vld [vmem:[%s6532_s1 + $0x1e8] sm:$0xff]  ;;  %v4927_v61 = vld [vmem:[%s6532_s1 + $0x158] sm:$0xff]  ;;  %v4926_v1 = vld [vmem:[%s6532_s1 + $0x150] sm:$0xff] }
  0x15   :  { %2824 = vmatpush.bf16.msra.mxu3 %v4911_v19  ;;  %v4935_v62 = vld [vmem:[%s6532_s1 + $0x198] sm:$0xff]  ;;  %v4934_v2 = vld [vmem:[%s6532_s1 + $0x190] sm:$0xff]  ;;  %v4917_v4 = vld [vmem:[%s6532_s1 + $0x108] sm:$0xff] }
  0x16   :  { %2783 = vmatpush.bf16.msra.mxu0 %v4886_v20  ;;  %v4943_v63 = vld [vmem:[%s6532_s1 + $0x1d8] sm:$0xff]  ;;  %v4942_v3 = vld [vmem:[%s6532_s1 + $0x1d0] sm:$0xff]  ;;  %v4925_v5 = vld [vmem:[%s6532_s1 + $0x148] sm:$0xff] }
  0x17   :  { %2797 = vmatpush.bf16.msra.mxu1 %v4894_v21  ;;  %v4933_v6 = vld [vmem:[%s6532_s1 + $0x188] sm:$0xff]  ;;  %v4916_v8 = vld [vmem:[%s6532_s1 + $0x100] sm:$0xff]  ;;  %v4955_v11 = vld [vmem:[%s6532_s1 + $0x238] sm:$0xff] }
  0x18   :  { %2811 = vmatpush.bf16.msra.mxu2 %v4902_v22  ;;  %v4941_v7 = vld [vmem:[%s6532_s1 + $0x1c8] sm:$0xff]  ;;  %v4924_v9 = vld [vmem:[%s6532_s1 + $0x140] sm:$0xff]  ;;  %v4963_v12 = vld [vmem:[%s6532_s1 + $0x278] sm:$0xff] }
  0x19   :  { %2825 = vmatpush.bf16.msra.mxu3 %v4910_v23  ;;  %v4932_v10 = vld [vmem:[%s6532_s1 + $0x180] sm:$0xff]  ;;  %v3451_v13 = vld [vmem:[%s6533_s0 + $0x10] sm:$0xf]  ;;  %v3459_v15 = vld [vmem:[%s6533_s0 + $0x18] sm:$0xf] }
  0x1a   :  { %2784 = vmatpush.bf16.msra.mxu0 %v4885_v24  ;;  %v4866_v14 = vld [vmem:[%s6533_s0 + $0xac] sm:$0xf0]  ;;  %v4867_v16 = vld [vmem:[%s6533_s0 + $0xb4] sm:$0xf0]  ;;  %v4846_v18 = vld [vmem:[%s6533_s0 + $0x14] sm:$0xf] }
  0x1b   :  { %2798 = vmatpush.bf16.msra.mxu1 %v4893_v25  ;;  %v4971_v17 = vld [vmem:[%s6532_s1 + $0x2b8] sm:$0xff]  ;;  %v3453_v19 = vld [vmem:[%s6533_s0 + $0xb0] sm:$0xf0]  ;;  %v4940_v20 = vld [vmem:[%s6532_s1 + $0x1c0] sm:$0xff]  ;;  %v3452_v23 = vor.u32 %v4866_v14, %v3451_v13  ;;  %v3460_v24 = vor.u32 %v4867_v16, %v3459_v15 }
  0x1c   :  { %2812 = vmatpush.bf16.msra.mxu2 %v4901_v26  ;;  %v4847_v21 = vld [vmem:[%s6533_s0 + $0x1c] sm:$0xf]  ;;  %v3456_v26 = vor.u32 %v4846_v18, %v3453_v19  ;;  %v4953_v32 = vld [vmem:[%s6532_s1 + $0x228] sm:$0xff]  ;;  %v4952_v36 = vld [vmem:[%s6532_s1 + $0x220] sm:$0xff] }
  0x1d   :  { %2826 = vmatpush.bf16.msra.mxu3 %v4909_v27  ;;  %v3461_v22 = vld [vmem:[%s6533_s0 + $0xb8] sm:$0xf0]  ;;  %v4961_v33 = vld [vmem:[%s6532_s1 + $0x268] sm:$0xff]  ;;  %v4968_v38 = vld [vmem:[%s6532_s1 + $0x2a0] sm:$0xff] }
  0x1e   :  { %2785 = vmatpush.bf16.msra.mxu0 %v4884_v28  ;;  %v4979_v25 = vld [vmem:[%s6532_s1 + $0x2f8] sm:$0xff]  ;;  %v3464_v27 = vor.u32 %v4847_v21, %v3461_v22  ;;  %v4954_v28 = vld [vmem:[%s6532_s1 + $0x230] sm:$0xff]  ;;  %v4977_v35 = vld [vmem:[%s6532_s1 + $0x2e8] sm:$0xff] }
  0x1f   :  { %2799 = vmatpush.bf16.msra.mxu1 %v4892_v29  ;;  %v4962_v29 = vld [vmem:[%s6532_s1 + $0x270] sm:$0xff]  ;;  %v4976_v39 = vld [vmem:[%s6532_s1 + $0x2e0] sm:$0xff]  ;;  %v4993_v13 = vld [vmem:[%s6532_s1 + $0x368] sm:$0xff] }
  0x20   :  { %2813 = vmatpush.bf16.msra.mxu2 %v4900_v30  ;;  %v4970_v30 = vld [vmem:[%s6532_s1 + $0x2b0] sm:$0xff]  ;;  %v5001_v14 = vld [vmem:[%s6532_s1 + $0x3a8] sm:$0xff]  ;;  %v4984_v16 = vld [vmem:[%s6532_s1 + $0x320] sm:$0xff] }
  0x21   :  { %2827 = vmatpush.bf16.msra.mxu3 %v4908_v40  ;;  %2786 = vmatmul.bf16.vlgmr.msra.gmra.mxu0 %v3436_v41  ;;  %v4951_v40 = vld [vmem:[%s6532_s1 + $0x218] sm:$0xff]  ;;  %v4950_v44 = vld [vmem:[%s6532_s1 + $0x210] sm:$0xff]  ;;  %v5009_v15 = vld [vmem:[%s6532_s1 + $0x3e8] sm:$0xff] }
  0x22   :  { %2834 = vmatpush.bf16.msrb.mxu0 %v4923_v31  ;;  %2800 = vmatmul.bf16.vlgmr.msra.gmra.mxu1 %v3440_v47  ;;  %v4978_v31 = vld [vmem:[%s6532_s1 + $0x2f0] sm:$0xff]  ;;  %v4959_v41 = vld [vmem:[%s6532_s1 + $0x258] sm:$0xff]  ;;  %v5000_v18 = vld [vmem:[%s6532_s1 + $0x3a0] sm:$0xff] }
  0x23   :  { %2848 = vmatpush.bf16.msrb.mxu1 %v4931_v34  ;;  %2814 = vmatmul.bf16.vlgmr.msra.gmra.mxu2 %v3444_v43  ;;  %v4969_v34 = vld [vmem:[%s6532_s1 + $0x2a8] sm:$0xff]  ;;  %v4975_v43 = vld [vmem:[%s6532_s1 + $0x2d8] sm:$0xff]  ;;  %v4958_v45 = vld [vmem:[%s6532_s1 + $0x250] sm:$0xff] }
  0x24   :  { %2862 = vmatpush.bf16.msrb.mxu2 %v4939_v37  ;;  %2828 = vmatmul.bf16.vlgmr.msra.gmra.mxu3 %v3448_v50  ;;  %v4960_v37 = vld [vmem:[%s6532_s1 + $0x260] sm:$0xff]  ;;  %v4974_v47 = vld [vmem:[%s6532_s1 + $0x2d0] sm:$0xff]  ;;  %v4965_v50 = vld [vmem:[%s6532_s1 + $0x288] sm:$0xff] }
  0x25   :  { %2876 = vmatpush.bf16.msrb.mxu3 %v4947_v42  ;;  %v4967_v42 = vld [vmem:[%s6532_s1 + $0x298] sm:$0xff]  ;;  %v5008_v19 = vld [vmem:[%s6532_s1 + $0x3e0] sm:$0xff] }
  0x26   :  { %2835 = vmatpush.bf16.msrb.mxu0 %v4922_v46  ;;  %v4966_v46 = vld [vmem:[%s6532_s1 + $0x290] sm:$0xff]  ;;  %v4991_v21 = vld [vmem:[%s6532_s1 + $0x358] sm:$0xff] }
  0x27   :  { %2849 = vmatpush.bf16.msrb.mxu1 %v4930_v48  ;;  %v4949_v48 = vld [vmem:[%s6532_s1 + $0x208] sm:$0xff]  ;;  %v4999_v22 = vld [vmem:[%s6532_s1 + $0x398] sm:$0xff] }
  0x28   :  { %2863 = vmatpush.bf16.msrb.mxu2 %v4938_v49  ;;  %v4957_v49 = vld [vmem:[%s6532_s1 + $0x248] sm:$0xff] }
  0x29   :  { %2877 = vmatpush.bf16.msrb.mxu3 %v4946_v51  ;;  %v4973_v51 = vld [vmem:[%s6532_s1 + $0x2c8] sm:$0xff] }
  0x2a   :  { %2836 = vmatpush.bf16.msrb.mxu0 %v4921_v52  ;;  %v4948_v52 = vld [vmem:[%s6532_s1 + $0x200] sm:$0xff] }
  0x2b   :  { %2850 = vmatpush.bf16.msrb.mxu1 %v4929_v53  ;;  %v4956_v53 = vld [vmem:[%s6532_s1 + $0x240] sm:$0xff] }
  0x2c   :  { %2864 = vmatpush.bf16.msrb.mxu2 %v4937_v54  ;;  %v4964_v54 = vld [vmem:[%s6532_s1 + $0x280] sm:$0xff] }
  0x2d   :  { %2878 = vmatpush.bf16.msrb.mxu3 %v4945_v55  ;;  %v4987_v55 = vld [vmem:[%s6532_s1 + $0x338] sm:$0xff] }
  0x2e   :  { %2837 = vmatpush.bf16.msrb.mxu0 %v4920_v56  ;;  %v4995_v56 = vld [vmem:[%s6532_s1 + $0x378] sm:$0xff] }
  0x2f   :  { %2851 = vmatpush.bf16.msrb.mxu1 %v4928_v57  ;;  %v3467_v57 = vld [vmem:[%s6533_s0 + $0x20] sm:$0xf] }
  0x30   :  { %2865 = vmatpush.bf16.msrb.mxu2 %v4936_v58  ;;  %v4868_v58 = vld [vmem:[%s6533_s0 + $0xbc] sm:$0xf0] }
  0x31   :  { %2879 = vmatpush.bf16.msrb.mxu3 %v4944_v59  ;;  %v3475_v59 = vld [vmem:[%s6533_s0 + $0x28] sm:$0xf] }
  0x32   :  { %2838 = vmatpush.bf16.msrb.mxu0 %v4919_v60  ;;  %v4869_v60 = vld [vmem:[%s6533_s0 + $0xc4] sm:$0xf0] }
  0x33   :  { %2852 = vmatpush.bf16.msrb.mxu1 %v4927_v61  ;;  %v5003_v61 = vld [vmem:[%s6532_s1 + $0x3b8] sm:$0xff] }
  0x34   :  { %2866 = vmatpush.bf16.msrb.mxu2 %v4935_v62  ;;  %v4848_v62 = vld [vmem:[%s6533_s0 + $0x24] sm:$0xf] }
  0x35   :  { %2880 = vmatpush.bf16.msrb.mxu3 %v4943_v63  ;;  %v3469_v63 = vld [vmem:[%s6533_s0 + $0xc0] sm:$0xf0] }
  0x36   :  { %2839 = vmatpush.bf16.msrb.mxu0 %v4918_v0  ;;  %v4972_v0 = vld [vmem:[%s6532_s1 + $0x2c0] sm:$0xff] }
  0x37   :  { %2853 = vmatpush.bf16.msrb.mxu1 %v4926_v1  ;;  %v4849_v1 = vld [vmem:[%s6533_s0 + $0x2c] sm:$0xf] }
  0x38   :  { %2867 = vmatpush.bf16.msrb.mxu2 %v4934_v2  ;;  %v3477_v2 = vld [vmem:[%s6533_s0 + $0xc8] sm:$0xf0] }
  0x39   :  { %2881 = vmatpush.bf16.msrb.mxu3 %v4942_v3  ;;  %v3468_v3 = vor.u32 %v4868_v58, %v3467_v57  ;;  %v5025_v57 = vld [vmem:[%s6532_s1 + $0x468] sm:$0xff] }
  0x3a   :  { %2840 = vmatpush.bf16.msrb.mxu0 %v4917_v4  ;;  %v3476_v4 = vor.u32 %v4869_v60, %v3475_v59  ;;  %v5033_v58 = vld [vmem:[%s6532_s1 + $0x4a8] sm:$0xff]  ;;  %v5016_v60 = vld [vmem:[%s6532_s1 + $0x420] sm:$0xff] }
  0x3b   :  { %2854 = vmatpush.bf16.msrb.mxu1 %v4925_v5  ;;  %v5011_v5 = vld [vmem:[%s6532_s1 + $0x3f8] sm:$0xff]  ;;  %v5041_v59 = vld [vmem:[%s6532_s1 + $0x4e8] sm:$0xff] }
  0x3c   :  { %2868 = vmatpush.bf16.msrb.mxu2 %v4933_v6  ;;  %v3472_v6 = vor.u32 %v4848_v62, %v3469_v63  ;;  %v5032_v62 = vld [vmem:[%s6532_s1 + $0x4a0] sm:$0xff] }
  0x3d   :  { %2882 = vmatpush.bf16.msrb.mxu3 %v4941_v7  ;;  %v3480_v7 = vor.u32 %v4849_v1, %v3477_v2  ;;  %v5040_v63 = vld [vmem:[%s6532_s1 + $0x4e0] sm:$0xff]  ;;  %v5023_v1 = vld [vmem:[%s6532_s1 + $0x458] sm:$0xff] }
  0x3e   :  { %2841 = vmatpush.bf16.msrb.mxu0 %v4916_v8  ;;  %v4986_v8 = vld [vmem:[%s6532_s1 + $0x330] sm:$0xff]  ;;  %v5031_v2 = vld [vmem:[%s6532_s1 + $0x498] sm:$0xff] }
  0x3f   :  { %2855 = vmatpush.bf16.msrb.mxu1 %v4924_v9  ;;  %v4994_v9 = vld [vmem:[%s6532_s1 + $0x370] sm:$0xff] }
  0x40   :  { %2869 = vmatpush.bf16.msrb.mxu2 %v4932_v10  ;;  %v5002_v10 = vld [vmem:[%s6532_s1 + $0x3b0] sm:$0xff] }
  0x41   :  { %2883 = vmatpush.bf16.msrb.mxu3 %v4940_v20  ;;  %2842 = vmatmul.bf16.vlgmr.msrb.gmra.mxu0 %v3452_v23  ;;  %v4983_v20 = vld [vmem:[%s6532_s1 + $0x318] sm:$0xff] }
  0x42   :  { %2890 = vmatpush.bf16.msra.mxu0 %v4955_v11  ;;  %2856 = vmatmul.bf16.vlgmr.msrb.gmra.mxu1 %v3456_v26  ;;  %v5010_v11 = vld [vmem:[%s6532_s1 + $0x3f0] sm:$0xff]  ;;  %v5007_v23 = vld [vmem:[%s6532_s1 + $0x3d8] sm:$0xff] }
  0x43   :  { %2904 = vmatpush.bf16.msra.mxu1 %v4963_v12  ;;  %2870 = vmatmul.bf16.vlgmr.msrb.gmra.mxu2 %v3460_v24  ;;  %v4985_v12 = vld [vmem:[%s6532_s1 + $0x328] sm:$0xff]  ;;  %v4982_v24 = vld [vmem:[%s6532_s1 + $0x310] sm:$0xff] }
  0x44   :  { %2918 = vmatpush.bf16.msra.mxu2 %v4971_v17  ;;  %2884 = vmatmul.bf16.vlgmr.msrb.gmra.mxu3 %v3464_v27  ;;  %v4992_v17 = vld [vmem:[%s6532_s1 + $0x360] sm:$0xff]  ;;  %v4998_v26 = vld [vmem:[%s6532_s1 + $0x390] sm:$0xff] }
  0x45   :  { %2932 = vmatpush.bf16.msra.mxu3 %v4979_v25  ;;  %v4990_v25 = vld [vmem:[%s6532_s1 + $0x350] sm:$0xff] }
  0x46   :  { %2891 = vmatpush.bf16.msra.mxu0 %v4954_v28  ;;  %v5006_v27 = vld [vmem:[%s6532_s1 + $0x3d0] sm:$0xff]  ;;  %v4981_v28 = vld [vmem:[%s6532_s1 + $0x308] sm:$0xff] }
  0x47   :  { %2905 = vmatpush.bf16.msra.mxu1 %v4962_v29  ;;  %v4989_v29 = vld [vmem:[%s6532_s1 + $0x348] sm:$0xff] }
  0x48   :  { %2919 = vmatpush.bf16.msra.mxu2 %v4970_v30  ;;  %v4997_v30 = vld [vmem:[%s6532_s1 + $0x388] sm:$0xff] }
  0x49   :  { %2933 = vmatpush.bf16.msra.mxu3 %v4978_v31  ;;  %v5005_v31 = vld [vmem:[%s6532_s1 + $0x3c8] sm:$0xff] }
  0x4a   :  { %2892 = vmatpush.bf16.msra.mxu0 %v4953_v32  ;;  %v4980_v32 = vld [vmem:[%s6532_s1 + $0x300] sm:$0xff] }
  0x4b   :  { %2906 = vmatpush.bf16.msra.mxu1 %v4961_v33  ;;  %v4988_v33 = vld [vmem:[%s6532_s1 + $0x340] sm:$0xff] }
  0x4c   :  { %2920 = vmatpush.bf16.msra.mxu2 %v4969_v34  ;;  %v4996_v34 = vld [vmem:[%s6532_s1 + $0x380] sm:$0xff] }
  0x4d   :  { %2934 = vmatpush.bf16.msra.mxu3 %v4977_v35  ;;  %v5019_v35 = vld [vmem:[%s6532_s1 + $0x438] sm:$0xff] }
  0x4e   :  { %2893 = vmatpush.bf16.msra.mxu0 %v4952_v36  ;;  %v5027_v36 = vld [vmem:[%s6532_s1 + $0x478] sm:$0xff] }
  0x4f   :  { %2907 = vmatpush.bf16.msra.mxu1 %v4960_v37  ;;  %v3483_v37 = vld [vmem:[%s6533_s0 + $0x30] sm:$0xf] }
  0x50   :  { %2921 = vmatpush.bf16.msra.mxu2 %v4968_v38  ;;  %v4870_v38 = vld [vmem:[%s6533_s0 + $0xcc] sm:$0xf0] }
  0x51   :  { %2935 = vmatpush.bf16.msra.mxu3 %v4976_v39  ;;  %v3491_v39 = vld [vmem:[%s6533_s0 + $0x38] sm:$0xf] }
  0x52   :  { %2894 = vmatpush.bf16.msra.mxu0 %v4951_v40  ;;  %v4871_v40 = vld [vmem:[%s6533_s0 + $0xd4] sm:$0xf0] }
  0x53   :  { %2908 = vmatpush.bf16.msra.mxu1 %v4959_v41  ;;  %v5035_v41 = vld [vmem:[%s6532_s1 + $0x4b8] sm:$0xff] }
  0x54   :  { %2922 = vmatpush.bf16.msra.mxu2 %v4967_v42  ;;  %v4850_v42 = vld [vmem:[%s6533_s0 + $0x34] sm:$0xf] }
  0x55   :  { %2936 = vmatpush.bf16.msra.mxu3 %v4975_v43  ;;  %v3485_v43 = vld [vmem:[%s6533_s0 + $0xd0] sm:$0xf0] }
  0x56   :  { %2895 = vmatpush.bf16.msra.mxu0 %v4950_v44  ;;  %v5004_v44 = vld [vmem:[%s6532_s1 + $0x3c0] sm:$0xff] }
  0x57   :  { %2909 = vmatpush.bf16.msra.mxu1 %v4958_v45  ;;  %v4851_v45 = vld [vmem:[%s6533_s0 + $0x3c] sm:$0xf] }
  0x58   :  { %2923 = vmatpush.bf16.msra.mxu2 %v4966_v46  ;;  %v3493_v46 = vld [vmem:[%s6533_s0 + $0xd8] sm:$0xf0] }
  0x59   :  { %2937 = vmatpush.bf16.msra.mxu3 %v4974_v47  ;;  %v3484_v47 = vor.u32 %v4870_v38, %v3483_v37  ;;  %v5212_v37 = vld [vmem:[%s6534_s2] ss:$0 sm:$0xff]  ;;  %v5057_v38 = vld [vmem:[%s6532_s1 + $0x568] sm:$0xff] }
  0x5a   :  { %2896 = vmatpush.bf16.msra.mxu0 %v4949_v48  ;;  %v3492_v48 = vor.u32 %v4871_v40, %v3491_v39  ;;  %v5065_v39 = vld [vmem:[%s6532_s1 + $0x5a8] sm:$0xff] }
  0x5b   :  { %2910 = vmatpush.bf16.msra.mxu1 %v4957_v49  ;;  %v5043_v49 = vld [vmem:[%s6532_s1 + $0x4f8] sm:$0xff]  ;;  %v5073_v40 = vld [vmem:[%s6532_s1 + $0x5e8] sm:$0xff] }
  0x5c   :  { %2924 = vmatpush.bf16.msra.mxu2 %v4965_v50  ;;  %v3488_v50 = vor.u32 %v4850_v42, %v3485_v43  ;;  %v5048_v42 = vld [vmem:[%s6532_s1 + $0x520] sm:$0xff] }
  0x5d   :  { %2938 = vmatpush.bf16.msra.mxu3 %v4973_v51  ;;  %v3496_v51 = vor.u32 %v4851_v45, %v3493_v46  ;;  %v5064_v45 = vld [vmem:[%s6532_s1 + $0x5a0] sm:$0xff] }
  0x5e   :  { %2897 = vmatpush.bf16.msra.mxu0 %v4948_v52  ;;  %v5018_v52 = vld [vmem:[%s6532_s1 + $0x430] sm:$0xff] }
  0x5f   :  { %2911 = vmatpush.bf16.msra.mxu1 %v4956_v53  ;;  %v5026_v53 = vld [vmem:[%s6532_s1 + $0x470] sm:$0xff] }
  0x60   :  { %2925 = vmatpush.bf16.msra.mxu2 %v4964_v54  ;;  %v5034_v54 = vld [vmem:[%s6532_s1 + $0x4b0] sm:$0xff] }
  0x61   :  { %2939 = vmatpush.bf16.msra.mxu3 %v4972_v0  ;;  %2898 = vmatmul.bf16.vlgmr.msra.gmra.mxu0 %v3468_v3  ;;  %v5015_v0 = vld [vmem:[%s6532_s1 + $0x418] sm:$0xff] }
  0x62   :  { %2946 = vmatpush.bf16.msrb.mxu0 %v4987_v55  ;;  %2912 = vmatmul.bf16.vlgmr.msra.gmra.mxu1 %v3472_v6  ;;  %v5042_v55 = vld [vmem:[%s6532_s1 + $0x4f0] sm:$0xff]  ;;  %v5039_v3 = vld [vmem:[%s6532_s1 + $0x4d8] sm:$0xff] }
  0x63   :  { %2960 = vmatpush.bf16.msrb.mxu1 %v4995_v56  ;;  %2926 = vmatmul.bf16.vlgmr.msra.gmra.mxu2 %v3476_v4  ;;  %v5017_v56 = vld [vmem:[%s6532_s1 + $0x428] sm:$0xff]  ;;  %v5014_v4 = vld [vmem:[%s6532_s1 + $0x410] sm:$0xff] }
  0x64   :  { %2974 = vmatpush.bf16.msrb.mxu2 %v5003_v61  ;;  %2940 = vmatmul.bf16.vlgmr.msra.gmra.mxu3 %v3480_v7  ;;  %v5024_v61 = vld [vmem:[%s6532_s1 + $0x460] sm:$0xff]  ;;  %v5030_v6 = vld [vmem:[%s6532_s1 + $0x490] sm:$0xff] }
  0x65   :  { %2988 = vmatpush.bf16.msrb.mxu3 %v5011_v5  ;;  %v5022_v5 = vld [vmem:[%s6532_s1 + $0x450] sm:$0xff] }
  0x66   :  { %2947 = vmatpush.bf16.msrb.mxu0 %v4986_v8  ;;  %v5038_v7 = vld [vmem:[%s6532_s1 + $0x4d0] sm:$0xff]  ;;  %v5013_v8 = vld [vmem:[%s6532_s1 + $0x408] sm:$0xff] }
  0x67   :  { %2961 = vmatpush.bf16.msrb.mxu1 %v4994_v9  ;;  %v5021_v9 = vld [vmem:[%s6532_s1 + $0x448] sm:$0xff] }
  0x68   :  { %2975 = vmatpush.bf16.msrb.mxu2 %v5002_v10  ;;  %v5029_v10 = vld [vmem:[%s6532_s1 + $0x488] sm:$0xff] }
  0x69   :  { %2989 = vmatpush.bf16.msrb.mxu3 %v5010_v11  ;;  %v5037_v11 = vld [vmem:[%s6532_s1 + $0x4c8] sm:$0xff] }
  0x6a   :  { %2948 = vmatpush.bf16.msrb.mxu0 %v4985_v12  ;;  %v5012_v12 = vld [vmem:[%s6532_s1 + $0x400] sm:$0xff] }
  0x6b   :  { %2962 = vmatpush.bf16.msrb.mxu1 %v4993_v13  ;;  %v5020_v13 = vld [vmem:[%s6532_s1 + $0x440] sm:$0xff] }
  0x6c   :  { %2976 = vmatpush.bf16.msrb.mxu2 %v5001_v14  ;;  %v5028_v14 = vld [vmem:[%s6532_s1 + $0x480] sm:$0xff] }
  0x6d   :  { %2990 = vmatpush.bf16.msrb.mxu3 %v5009_v15  ;;  %v5051_v15 = vld [vmem:[%s6532_s1 + $0x538] sm:$0xff] }
  0x6e   :  { %2949 = vmatpush.bf16.msrb.mxu0 %v4984_v16  ;;  %v5059_v16 = vld [vmem:[%s6532_s1 + $0x578] sm:$0xff] }
  0x6f   :  { %2963 = vmatpush.bf16.msrb.mxu1 %v4992_v17  ;;  %v3499_v17 = vld [vmem:[%s6533_s0 + $0x40] sm:$0xf] }
  0x70   :  { %2977 = vmatpush.bf16.msrb.mxu2 %v5000_v18  ;;  %v4872_v18 = vld [vmem:[%s6533_s0 + $0xdc] sm:$0xf0] }
  0x71   :  { %2991 = vmatpush.bf16.msrb.mxu3 %v5008_v19  ;;  %v3507_v19 = vld [vmem:[%s6533_s0 + $0x48] sm:$0xf] }
  0x72   :  { %2950 = vmatpush.bf16.msrb.mxu0 %v4983_v20  ;;  %v4873_v20 = vld [vmem:[%s6533_s0 + $0xe4] sm:$0xf0] }
  0x73   :  { %2964 = vmatpush.bf16.msrb.mxu1 %v4991_v21  ;;  %v5067_v21 = vld [vmem:[%s6532_s1 + $0x5b8] sm:$0xff] }
  0x74   :  { %2978 = vmatpush.bf16.msrb.mxu2 %v4999_v22  ;;  %v4852_v22 = vld [vmem:[%s6533_s0 + $0x44] sm:$0xf] }
  0x75   :  { %2992 = vmatpush.bf16.msrb.mxu3 %v5007_v23  ;;  %v3501_v23 = vld [vmem:[%s6533_s0 + $0xe0] sm:$0xf0] }
  0x76   :  { %2951 = vmatpush.bf16.msrb.mxu0 %v4982_v24  ;;  %v5036_v24 = vld [vmem:[%s6532_s1 + $0x4c0] sm:$0xff] }
  0x77   :  { %2965 = vmatpush.bf16.msrb.mxu1 %v4990_v25  ;;  %v4853_v25 = vld [vmem:[%s6533_s0 + $0x4c] sm:$0xf] }
  0x78   :  { %2979 = vmatpush.bf16.msrb.mxu2 %v4998_v26  ;;  %v3509_v26 = vld [vmem:[%s6533_s0 + $0xe8] sm:$0xf0] }
  0x79   :  { %2993 = vmatpush.bf16.msrb.mxu3 %v5006_v27  ;;  %v3500_v27 = vor.u32 %v4872_v18, %v3499_v17  ;;  %v5099_v17 = vld [vmem:[%s6532_s1 + $0x6b8] sm:$0xff]  ;;  %v4854_v18 = vld [vmem:[%s6533_s0 + $0x54] sm:$0xf] }
  0x7a   :  { %2952 = vmatpush.bf16.msrb.mxu0 %v4981_v28  ;;  %v3508_v28 = vor.u32 %v4873_v20, %v3507_v19  ;;  %v3517_v19 = vld [vmem:[%s6533_s0 + $0xf0] sm:$0xf0] }
  0x7b   :  { %2966 = vmatpush.bf16.msrb.mxu1 %v4989_v29  ;;  %v5075_v29 = vld [vmem:[%s6532_s1 + $0x5f8] sm:$0xff] }
  0x7c   :  { %2980 = vmatpush.bf16.msrb.mxu2 %v4997_v30  ;;  %v3504_v30 = vor.u32 %v4852_v22, %v3501_v23  ;;  %v4855_v22 = vld [vmem:[%s6533_s0 + $0x5c] sm:$0xf] }
  0x7d   :  { %2994 = vmatpush.bf16.msrb.mxu3 %v5005_v31  ;;  %v3512_v31 = vor.u32 %v4853_v25, %v3509_v26  ;;  %v3525_v23 = vld [vmem:[%s6533_s0 + $0xf8] sm:$0xf0] }
  0x7e   :  { %2953 = vmatpush.bf16.msrb.mxu0 %v4980_v32  ;;  %v5050_v32 = vld [vmem:[%s6532_s1 + $0x530] sm:$0xff]  ;;  %v5107_v26 = vld [vmem:[%s6532_s1 + $0x6f8] sm:$0xff] }
  0x7f   :  { %2967 = vmatpush.bf16.msrb.mxu1 %v4988_v33  ;;  %v5058_v33 = vld [vmem:[%s6532_s1 + $0x570] sm:$0xff] }
  0x80   :  { %2981 = vmatpush.bf16.msrb.mxu2 %v4996_v34  ;;  %v5066_v34 = vld [vmem:[%s6532_s1 + $0x5b0] sm:$0xff] }
  0x81   :  { %2995 = vmatpush.bf16.msrb.mxu3 %v5004_v44  ;;  %2954 = vmatmul.bf16.vlgmr.msrb.gmra.mxu0 %v3484_v47  ;;  %v5056_v44 = vld [vmem:[%s6532_s1 + $0x560] sm:$0xff] }
  0x82   :  { %3002 = vmatpush.bf16.msra.mxu0 %v5019_v35  ;;  %2968 = vmatmul.bf16.vlgmr.msrb.gmra.mxu1 %v3488_v50  ;;  %v5074_v35 = vld [vmem:[%s6532_s1 + $0x5f0] sm:$0xff]  ;;  %v5055_v50 = vld [vmem:[%s6532_s1 + $0x558] sm:$0xff] }
  0x83   :  { %3016 = vmatpush.bf16.msra.mxu1 %v5027_v36  ;;  %2982 = vmatmul.bf16.vlgmr.msrb.gmra.mxu2 %v3492_v48  ;;  %v5049_v36 = vld [vmem:[%s6532_s1 + $0x528] sm:$0xff]  ;;  %v5072_v48 = vld [vmem:[%s6532_s1 + $0x5e0] sm:$0xff] }
  0x84   :  { %3030 = vmatpush.bf16.msra.mxu2 %v5035_v41  ;;  %2996 = vmatmul.bf16.vlgmr.msrb.gmra.mxu3 %v3496_v51  ;;  %v5063_v51 = vld [vmem:[%s6532_s1 + $0x598] sm:$0xff] }
  0x85   :  { %3044 = vmatpush.bf16.msra.mxu3 %v5043_v49  ;;  %v5047_v49 = vld [vmem:[%s6532_s1 + $0x518] sm:$0xff] }
  0x86   :  { %3003 = vmatpush.bf16.msra.mxu0 %v5018_v52 }
  0x87   :  { %3017 = vmatpush.bf16.msra.mxu1 %v5026_v53  ;;  %v5071_v53 = vld [vmem:[%s6532_s1 + $0x5d8] sm:$0xff] }
  0x88   :  { %3031 = vmatpush.bf16.msra.mxu2 %v5034_v54 }
  0x89   :  { %3045 = vmatpush.bf16.msra.mxu3 %v5042_v55 }
  0x8a   :  { %3004 = vmatpush.bf16.msra.mxu0 %v5017_v56  ;;  %v5046_v56 = vld [vmem:[%s6532_s1 + $0x510] sm:$0xff] }
  0x8b   :  { %3018 = vmatpush.bf16.msra.mxu1 %v5025_v57 }
  0x8c   :  { %3032 = vmatpush.bf16.msra.mxu2 %v5033_v58  ;;  %v5054_v58 = vld [vmem:[%s6532_s1 + $0x550] sm:$0xff] }
  0x8d   :  { %3046 = vmatpush.bf16.msra.mxu3 %v5041_v59  ;;  %v5062_v59 = vld [vmem:[%s6532_s1 + $0x590] sm:$0xff] }
  0x8e   :  { %3005 = vmatpush.bf16.msra.mxu0 %v5016_v60 }
  0x8f   :  { %3019 = vmatpush.bf16.msra.mxu1 %v5024_v61 }
  0x90   :  { %3033 = vmatpush.bf16.msra.mxu2 %v5032_v62 }
  0x91   :  { %3047 = vmatpush.bf16.msra.mxu3 %v5040_v63 }
  0x92   :  { %3006 = vmatpush.bf16.msra.mxu0 %v5015_v0  ;;  %v5070_v0 = vld [vmem:[%s6532_s1 + $0x5d0] sm:$0xff] }
  0x93   :  { %3020 = vmatpush.bf16.msra.mxu1 %v5023_v1  ;;  %v5045_v1 = vld [vmem:[%s6532_s1 + $0x508] sm:$0xff] }
  0x94   :  { %3034 = vmatpush.bf16.msra.mxu2 %v5031_v2  ;;  %v5053_v2 = vld [vmem:[%s6532_s1 + $0x548] sm:$0xff] }
  0x95   :  { %3048 = vmatpush.bf16.msra.mxu3 %v5039_v3  ;;  %v5061_v3 = vld [vmem:[%s6532_s1 + $0x588] sm:$0xff] }
  0x96   :  { %3007 = vmatpush.bf16.msra.mxu0 %v5014_v4  ;;  %v5069_v4 = vld [vmem:[%s6532_s1 + $0x5c8] sm:$0xff] }
  0x97   :  { %3021 = vmatpush.bf16.msra.mxu1 %v5022_v5 }
  0x98   :  { %3035 = vmatpush.bf16.msra.mxu2 %v5030_v6  ;;  %v5044_v6 = vld [vmem:[%s6532_s1 + $0x500] sm:$0xff] }
  0x99   :  { %3049 = vmatpush.bf16.msra.mxu3 %v5038_v7  ;;  %v5052_v7 = vld [vmem:[%s6532_s1 + $0x540] sm:$0xff] }
  0x9a   :  { %3008 = vmatpush.bf16.msra.mxu0 %v5013_v8  ;;  %v5060_v8 = vld [vmem:[%s6532_s1 + $0x580] sm:$0xff] }
  0x9b   :  { %3022 = vmatpush.bf16.msra.mxu1 %v5021_v9 }
  0x9c   :  { %3036 = vmatpush.bf16.msra.mxu2 %v5029_v10  ;;  %v5083_v10 = vld [vmem:[%s6532_s1 + $0x638] sm:$0xff] }
  0x9d   :  { %3050 = vmatpush.bf16.msra.mxu3 %v5037_v11  ;;  %v5091_v11 = vld [vmem:[%s6532_s1 + $0x678] sm:$0xff] }
  0x9e   :  { %3009 = vmatpush.bf16.msra.mxu0 %v5012_v12  ;;  %v2787_v41 = vpop.f32.mrf.mxu0  ;;  %v3515_v12 = vld [vmem:[%s6533_s0 + $0x50] sm:$0xf] }
  0x9f   :  { %3023 = vmatpush.bf16.msra.mxu1 %v5020_v13  ;;  %v2788_v43 = vadd.f32 %v5212_v37, %v2787_v41  ;;  %v2801_v46 = vpop.f32.mrf.mxu1  ;;  %v4874_v13 = vld [vmem:[%s6533_s0 + $0xec] sm:$0xf0]  ;;  %v5088_v41 = vld [vmem:[%s6532_s1 + $0x660] sm:$0xff] }
  0xa0   :  { %3037 = vmatpush.bf16.msra.mxu2 %v5028_v14  ;;  %v3523_v14 = vld [vmem:[%s6533_s0 + $0x58] sm:$0xf] }
  0xa1   :  { %3051 = vmatpush.bf16.msra.mxu3 %v5036_v24  ;;  %3010 = vmatmul.bf16.vlgmr.msra.gmra.mxu0 %v3500_v27  ;;  %v2802_v47 = vadd.f32 %v2801_v46, %v2788_v43  ;;  %v3516_v24 = vor.u32 %v4874_v13, %v3515_v12  ;;  %v3520_v27 = vor.u32 %v4854_v18, %v3517_v19  ;;  %v5087_v46 = vld [vmem:[%s6532_s1 + $0x658] sm:$0xff]  ;;  %v3539_v12 = vld [vmem:[%s6533_s0 + $0x68] sm:$0xf]  ;;  %v4857_v18 = vld [vmem:[%s6533_s0 + $0x6c] sm:$0xf] }
  0xa2   :  { %3058 = vmatpush.bf16.msrb.mxu0 %v5051_v15  ;;  %3024 = vmatmul.bf16.vlgmr.msra.gmra.mxu1 %v3504_v30  ;;  %v4875_v15 = vld [vmem:[%s6533_s0 + $0xf4] sm:$0xf0]  ;;  %v5090_v30 = vld [vmem:[%s6532_s1 + $0x670] sm:$0xff]  ;;  %v4877_v13 = vld [vmem:[%s6533_s0 + $0x104] sm:$0xf0] }
  0xa3   :  { %3072 = vmatpush.bf16.msrb.mxu1 %v5059_v16  ;;  %3038 = vmatmul.bf16.vlgmr.msra.gmra.mxu2 %v3508_v28  ;;  %v3524_v25 = vor.u32 %v4875_v15, %v3523_v14  ;;  %v3528_v28 = vor.u32 %v4855_v22, %v3525_v23  ;;  %v5131_v14 = vld [vmem:[%s6532_s1 + $0x7b8] sm:$0xff]  ;;  %v4856_v15 = vld [vmem:[%s6533_s0 + $0x64] sm:$0xf]  ;;  %v3541_v19 = vld [vmem:[%s6533_s0 + $0x108] sm:$0xf0] }
  0xa4   :  { %3086 = vmatpush.bf16.msrb.mxu2 %v5067_v21  ;;  %3052 = vmatmul.bf16.vlgmr.msra.gmra.mxu3 %v3512_v31  ;;  %v5068_v21 = vld [vmem:[%s6532_s1 + $0x5c0] sm:$0xff]  ;;  %v5098_v31 = vld [vmem:[%s6532_s1 + $0x6b0] sm:$0xff]  ;;  %v5139_v22 = vld [vmem:[%s6532_s1 + $0x7f8] sm:$0xff] }
  0xa5   :  { %3100 = vmatpush.bf16.msrb.mxu3 %v5075_v29  ;;  %v5082_v29 = vld [vmem:[%s6532_s1 + $0x630] sm:$0xff] }
  0xa6   :  { %3059 = vmatpush.bf16.msrb.mxu0 %v5050_v32  ;;  %v2815_v52 = vpop.f32.mrf.mxu2  ;;  %v2789_v55 = vpop.f32.mrf.mxu0  ;;  %v5106_v32 = vld [vmem:[%s6532_s1 + $0x6f0] sm:$0xff] }
  0xa7   :  { %3073 = vmatpush.bf16.msrb.mxu1 %v5058_v33  ;;  %v2816_v54 = vadd.f32 %v2815_v52, %v2802_v47  ;;  %v2790_v57 = vadd.f32 %v5212_v37, %v2789_v55  ;;  %v2829_v60 = vpop.f32.mrf.mxu3  ;;  %v2803_v61 = vpop.f32.mrf.mxu1  ;;  %v5081_v33 = vld [vmem:[%s6532_s1 + $0x628] sm:$0xff]  ;;  %v5095_v47 = vld [vmem:[%s6532_s1 + $0x698] sm:$0xff]  ;;  %v5078_v55 = vld [vmem:[%s6532_s1 + $0x610] sm:$0xff] }
  0xa8   :  { %3087 = vmatpush.bf16.msrb.mxu2 %v5066_v34  ;;  %v5089_v34 = vld [vmem:[%s6532_s1 + $0x668] sm:$0xff] }
  0xa9   :  { %3101 = vmatpush.bf16.msrb.mxu3 %v5074_v35  ;;  %v5927_v62 = vadd.f32 %v2829_v60, %v2816_v54  ;;  %v2804_v63 = vadd.f32 %v2803_v61, %v2790_v57  ;;  %v5097_v35 = vld [vmem:[%s6532_s1 + $0x6a8] sm:$0xff]  ;;  %v5086_v57 = vld [vmem:[%s6532_s1 + $0x650] sm:$0xff] }
  0xaa   :  { %3060 = vmatpush.bf16.msrb.mxu0 %v5049_v36  ;;  %v5105_v36 = vld [vmem:[%s6532_s1 + $0x6e8] sm:$0xff]  ;;  %v5102_v60 = vld [vmem:[%s6532_s1 + $0x6d0] sm:$0xff] }
  0xab   :  { %3074 = vmatpush.bf16.msrb.mxu1 %v5057_v38  ;;  %v5077_v61 = vld [vmem:[%s6532_s1 + $0x608] sm:$0xff] }
  0xac   :  { %3088 = vmatpush.bf16.msrb.mxu2 %v5065_v39  ;;  %v5080_v39 = vld [vmem:[%s6532_s1 + $0x620] sm:$0xff] }
  0xad   :  { %3102 = vmatpush.bf16.msrb.mxu3 %v5073_v40 }
  0xae   :  { %3061 = vmatpush.bf16.msrb.mxu0 %v5048_v42  ;;  %v2817_v5 = vpop.f32.mrf.mxu2  ;;  %v5096_v42 = vld [vmem:[%s6532_s1 + $0x6a0] sm:$0xff] }
  0xaf   :  { %3075 = vmatpush.bf16.msrb.mxu1 %v5056_v44  ;;  %v2818_v9 = vadd.f32 %v2817_v5, %v2804_v63  ;;  %v2831_v16 = vpop.f32.mrf.mxu3  ;;  %v5104_v44 = vld [vmem:[%s6532_s1 + $0x6e0] sm:$0xff]  ;;  %v5093_v63 = vld [vmem:[%s6532_s1 + $0x688] sm:$0xff] }
  0xb0   :  { %3089 = vmatpush.bf16.msrb.mxu2 %v5064_v45  ;;  %v5079_v45 = vld [vmem:[%s6532_s1 + $0x618] sm:$0xff]  ;;  %v5084_v5 = vld [vmem:[%s6532_s1 + $0x640] sm:$0xff] }
  0xb1   :  { %3103 = vmatpush.bf16.msrb.mxu3 %v5072_v48  ;;  %v2832_v20 = vadd.f32 %v2831_v16, %v2818_v9  ;;  %v5123_v9 = vld [vmem:[%s6532_s1 + $0x778] sm:$0xff]  ;;  %v3533_v16 = vld [vmem:[%s6533_s0 + $0x100] sm:$0xf0] }
  0xb2   :  { %3062 = vmatpush.bf16.msrb.mxu0 %v5047_v49  ;;  %v3536_v23 = vor.u32 %v4856_v15, %v3533_v16  ;;  %v5144_v15 = vld [vmem:[%s6532_s1 + $0x820] sm:$0xff] }
  0xb3   :  { %3076 = vmatpush.bf16.msrb.mxu1 %v5055_v50  ;;  %v5103_v50 = vld [vmem:[%s6532_s1 + $0x6d8] sm:$0xff]  ;;  %v5152_v16 = vld [vmem:[%s6532_s1 + $0x860] sm:$0xff] }
  0xb4   :  { %3090 = vmatpush.bf16.msrb.mxu2 %v5063_v51 }
  0xb5   :  { %3104 = vmatpush.bf16.msrb.mxu3 %v5071_v53 }
  0xb6   :  { %3063 = vmatpush.bf16.msrb.mxu0 %v5046_v56 }
  0xb7   :  { %3077 = vmatpush.bf16.msrb.mxu1 %v5054_v58  ;;  %v5094_v58 = vld [vmem:[%s6532_s1 + $0x690] sm:$0xff] }
  0xb8   :  { %3091 = vmatpush.bf16.msrb.mxu2 %v5062_v59 }
  0xb9   :  { %3105 = vmatpush.bf16.msrb.mxu3 %v5070_v0 }
  0xba   :  { %3064 = vmatpush.bf16.msrb.mxu0 %v5045_v1 }
  0xbb   :  { %3078 = vmatpush.bf16.msrb.mxu1 %v5053_v2  ;;  %v5101_v2 = vld [vmem:[%s6532_s1 + $0x6c8] sm:$0xff] }
  0xbc   :  { %3092 = vmatpush.bf16.msrb.mxu2 %v5061_v3 }
  0xbd   :  { %3106 = vmatpush.bf16.msrb.mxu3 %v5069_v4  ;;  %v5076_v4 = vld [vmem:[%s6532_s1 + $0x600] sm:$0xff] }
  0xbe   :  { %3065 = vmatpush.bf16.msrb.mxu0 %v5044_v6  ;;  %v2843_v37 = vpop.f32.mrf.mxu0  ;;  %v5092_v6 = vld [vmem:[%s6532_s1 + $0x680] sm:$0xff] }
  0xbf   :  { %3079 = vmatpush.bf16.msrb.mxu1 %v5052_v7  ;;  %v2844_v38 = vadd.f32 %v2843_v37, %v5927_v62  ;;  %v2857_v40 = vpop.f32.mrf.mxu1  ;;  %v5085_v62 = vld [vmem:[%s6532_s1 + $0x648] sm:$0xff]  ;;  %v5111_v37 = vld [vmem:[%s6532_s1 + $0x718] sm:$0xff] }
  0xc0   :  { %3093 = vmatpush.bf16.msrb.mxu2 %v5060_v8  ;;  %v5115_v8 = vld [vmem:[%s6532_s1 + $0x738] sm:$0xff] }
  0xc1   :  { %3107 = vmatpush.bf16.msrb.mxu3 %v5068_v21  ;;  %3066 = vmatmul.bf16.vlgmr.msrb.gmra.mxu0 %v3516_v24  ;;  %v2858_v43 = vadd.f32 %v2857_v40, %v2844_v38  ;;  %v3540_v21 = vor.u32 %v4877_v13, %v3539_v12  ;;  %v3544_v24 = vor.u32 %v4857_v18, %v3541_v19  ;;  %v5119_v38 = vld [vmem:[%s6532_s1 + $0x758] sm:$0xff]  ;;  %v5153_v12 = vld [vmem:[%s6532_s1 + $0x868] sm:$0xff]  ;;  %v5168_v18 = vld [vmem:[%s6532_s1 + $0x8e0] sm:$0xff] }
  0xc2   :  { %3114 = vmatpush.bf16.msra.mxu0 %v5083_v10  ;;  %3080 = vmatmul.bf16.vlgmr.msrb.gmra.mxu1 %v3520_v27  ;;  %v3531_v10 = vld [vmem:[%s6533_s0 + $0x60] sm:$0xf]  ;;  %v5130_v27 = vld [vmem:[%s6532_s1 + $0x7b0] sm:$0xff]  ;;  %v5135_v40 = vld [vmem:[%s6532_s1 + $0x7d8] sm:$0xff] }
  0xc3   :  { %3128 = vmatpush.bf16.msra.mxu1 %v5091_v11  ;;  %3094 = vmatmul.bf16.vlgmr.msrb.gmra.mxu2 %v3524_v25  ;;  %v4876_v11 = vld [vmem:[%s6533_s0 + $0xfc] sm:$0xf0]  ;;  %v5114_v25 = vld [vmem:[%s6532_s1 + $0x730] sm:$0xff]  ;;  %v5161_v13 = vld [vmem:[%s6532_s1 + $0x8a8] sm:$0xff] }
  0xc4   :  { %3142 = vmatpush.bf16.msra.mxu2 %v5099_v17  ;;  %3108 = vmatmul.bf16.vlgmr.msrb.gmra.mxu3 %v3528_v28  ;;  %v5100_v17 = vld [vmem:[%s6532_s1 + $0x6c0] sm:$0xff]  ;;  %v5138_v28 = vld [vmem:[%s6532_s1 + $0x7f0] sm:$0xff]  ;;  %v5143_v19 = vld [vmem:[%s6532_s1 + $0x818] sm:$0xff] }
  0xc5   :  { %3156 = vmatpush.bf16.msra.mxu3 %v5107_v26  ;;  %v5122_v26 = vld [vmem:[%s6532_s1 + $0x770] sm:$0xff] }
  0xc6   :  { %3115 = vmatpush.bf16.msra.mxu0 %v5082_v29  ;;  %v2871_v48 = vpop.f32.mrf.mxu2  ;;  %v2845_v51 = vpop.f32.mrf.mxu0  ;;  %v5113_v29 = vld [vmem:[%s6532_s1 + $0x728] sm:$0xff] }
  0xc7   :  { %3129 = vmatpush.bf16.msra.mxu1 %v5090_v30  ;;  %v2872_v49 = vadd.f32 %v2871_v48, %v2858_v43  ;;  %v2885_v52 = vpop.f32.mrf.mxu3  ;;  %v2846_v53 = vadd.f32 %v2845_v51, %v2832_v20  ;;  %v2859_v56 = vpop.f32.mrf.mxu1  ;;  %v3532_v20 = vor.u32 %v4876_v11, %v3531_v10  ;;  %v5121_v30 = vld [vmem:[%s6532_s1 + $0x768] sm:$0xff]  ;;  %v5126_v43 = vld [vmem:[%s6532_s1 + $0x790] sm:$0xff]  ;;  %v5124_v51 = vld [vmem:[%s6532_s1 + $0x780] sm:$0xff] }
  0xc8   :  { %3143 = vmatpush.bf16.msra.mxu2 %v5098_v31  ;;  %v5129_v31 = vld [vmem:[%s6532_s1 + $0x7a8] sm:$0xff]  ;;  %v5170_v10 = vld [vmem:[%s6532_s1 + $0x8f0] sm:$0xff] }
  0xc9   :  { %3157 = vmatpush.bf16.msra.mxu3 %v5106_v32  ;;  %v6041_v54 = vadd.f32 %v2885_v52, %v2872_v49  ;;  %v2860_v59 = vadd.f32 %v2859_v56, %v2846_v53  ;;  %v5137_v32 = vld [vmem:[%s6532_s1 + $0x7e8] sm:$0xff]  ;;  %v5108_v49 = vld [vmem:[%s6532_s1 + $0x700] sm:$0xff]  ;;  %v5147_v52 = vld [vmem:[%s6532_s1 + $0x838] sm:$0xff] }
  0xca   :  { %3116 = vmatpush.bf16.msra.mxu0 %v5081_v33  ;;  %v5112_v33 = vld [vmem:[%s6532_s1 + $0x720] sm:$0xff]  ;;  %v5133_v48 = vld [vmem:[%s6532_s1 + $0x7c8] sm:$0xff]  ;;  %v5155_v53 = vld [vmem:[%s6532_s1 + $0x878] sm:$0xff] }
  0xcb   :  { %3130 = vmatpush.bf16.msra.mxu1 %v5089_v34  ;;  %v5120_v34 = vld [vmem:[%s6532_s1 + $0x760] sm:$0xff]  ;;  %v4878_v56 = vld [vmem:[%s6533_s0 + $0x10c] sm:$0xf0]  ;;  %v5145_v11 = vld [vmem:[%s6532_s1 + $0x828] sm:$0xff] }
  0xcc   :  { %3144 = vmatpush.bf16.msra.mxu2 %v5097_v35  ;;  %v5128_v35 = vld [vmem:[%s6532_s1 + $0x7a0] sm:$0xff] }
  0xcd   :  { %3158 = vmatpush.bf16.msra.mxu3 %v5105_v36  ;;  %v5136_v36 = vld [vmem:[%s6532_s1 + $0x7e0] sm:$0xff] }
  0xce   :  { %3117 = vmatpush.bf16.msra.mxu0 %v5080_v39  ;;  %v2873_v0 = vpop.f32.mrf.mxu2  ;;  %v5127_v39 = vld [vmem:[%s6532_s1 + $0x798] sm:$0xff] }
  0xcf   :  { %3131 = vmatpush.bf16.msra.mxu1 %v5088_v41  ;;  %v2874_v1 = vadd.f32 %v2873_v0, %v2860_v59  ;;  %v2887_v3 = vpop.f32.mrf.mxu3  ;;  %v5110_v41 = vld [vmem:[%s6532_s1 + $0x710] sm:$0xff]  ;;  %v5163_v59 = vld [vmem:[%s6532_s1 + $0x8b8] sm:$0xff] }
  0xd0   :  { %3145 = vmatpush.bf16.msra.mxu2 %v5096_v42  ;;  %v5118_v42 = vld [vmem:[%s6532_s1 + $0x750] sm:$0xff]  ;;  %v3557_v0 = vld [vmem:[%s6533_s0 + $0x118] sm:$0xf0] }
  0xd1   :  { %3159 = vmatpush.bf16.msra.mxu3 %v5104_v44  ;;  %v6076_v7 = vadd.f32 %v2887_v3, %v2874_v1  ;;  %v5134_v44 = vld [vmem:[%s6532_s1 + $0x7d0] sm:$0xff]  ;;  %v5171_v3 = vld [vmem:[%s6532_s1 + $0x8f8] sm:$0xff] }
  0xd2   :  { %3118 = vmatpush.bf16.msra.mxu0 %v5079_v45  ;;  %v5109_v45 = vld [vmem:[%s6532_s1 + $0x708] sm:$0xff] }
  0xd3   :  { %3132 = vmatpush.bf16.msra.mxu1 %v5087_v46  ;;  %v5117_v46 = vld [vmem:[%s6532_s1 + $0x748] sm:$0xff] }
  0xd4   :  { %3146 = vmatpush.bf16.msra.mxu2 %v5095_v47  ;;  %v5125_v47 = vld [vmem:[%s6532_s1 + $0x788] sm:$0xff] }
  0xd5   :  { %3160 = vmatpush.bf16.msra.mxu3 %v5103_v50  ;;  %v5116_v50 = vld [vmem:[%s6532_s1 + $0x740] sm:$0xff] }
  0xd6   :  { %3119 = vmatpush.bf16.msra.mxu0 %v5078_v55  ;;  %v3547_v55 = vld [vmem:[%s6533_s0 + $0x70] sm:$0xf] }
  0xd7   :  { %3133 = vmatpush.bf16.msra.mxu1 %v5086_v57  ;;  %v3555_v57 = vld [vmem:[%s6533_s0 + $0x78] sm:$0xf]  ;;  %v3548_v1 = vor.u32 %v4878_v56, %v3547_v55  ;;  %v5186_v56 = vld [vmem:[%s6532_s1 + $0x970] sm:$0xff] }
  0xd8   :  { %3147 = vmatpush.bf16.msra.mxu2 %v5094_v58  ;;  %v4879_v58 = vld [vmem:[%s6533_s0 + $0x114] sm:$0xf0] }
  0xd9   :  { %3161 = vmatpush.bf16.msra.mxu3 %v5102_v60  ;;  %v4858_v60 = vld [vmem:[%s6533_s0 + $0x74] sm:$0xf] }
  0xda   :  { %3120 = vmatpush.bf16.msra.mxu0 %v5077_v61  ;;  %v3549_v61 = vld [vmem:[%s6533_s0 + $0x110] sm:$0xf0] }
  0xdb   :  { %3134 = vmatpush.bf16.msra.mxu1 %v5085_v62  ;;  %v5132_v62 = vld [vmem:[%s6532_s1 + $0x7c0] sm:$0xff] }
  0xdc   :  { %3148 = vmatpush.bf16.msra.mxu2 %v5093_v63  ;;  %v4859_v63 = vld [vmem:[%s6533_s0 + $0x7c] sm:$0xf] }
  0xdd   :  { %3162 = vmatpush.bf16.msra.mxu3 %v5101_v2  ;;  %v3556_v2 = vor.u32 %v4879_v58, %v3555_v57  ;;  %v5194_v57 = vld [vmem:[%s6532_s1 + $0x9b0] sm:$0xff]  ;;  %v5177_v58 = vld [vmem:[%s6532_s1 + $0x928] sm:$0xff] }
  0xde   :  { %3121 = vmatpush.bf16.msra.mxu0 %v5076_v4  ;;  %v3552_v4 = vor.u32 %v4858_v60, %v3549_v61  ;;  %v5193_v60 = vld [vmem:[%s6532_s1 + $0x9a8] sm:$0xff]  ;;  %v5176_v61 = vld [vmem:[%s6532_s1 + $0x920] sm:$0xff] }
  0xdf   :  { %3135 = vmatpush.bf16.msra.mxu1 %v5084_v5  ;;  %v3560_v5 = vor.u32 %v4859_v63, %v3557_v0  ;;  %v5192_v63 = vld [vmem:[%s6532_s1 + $0x9a0] sm:$0xff]  ;;  %v5175_v0 = vld [vmem:[%s6532_s1 + $0x918] sm:$0xff] }
  0xe0   :  { %3149 = vmatpush.bf16.msra.mxu2 %v5092_v6  ;;  %v5146_v6 = vld [vmem:[%s6532_s1 + $0x830] sm:$0xff] }
  0xe1   :  { %3163 = vmatpush.bf16.msra.mxu3 %v5100_v17  ;;  %3122 = vmatmul.bf16.vlgmr.msra.gmra.mxu0 %v3532_v20  ;;  %v5160_v17 = vld [vmem:[%s6532_s1 + $0x8a0] sm:$0xff]  ;;  %v5151_v20 = vld [vmem:[%s6532_s1 + $0x858] sm:$0xff] }
  0xe2   :  { %3170 = vmatpush.bf16.msrb.mxu0 %v5115_v8  ;;  %3136 = vmatmul.bf16.vlgmr.msra.gmra.mxu1 %v3536_v23  ;;  %v5154_v8 = vld [vmem:[%s6532_s1 + $0x870] sm:$0xff] }
  0xe3   :  { %3184 = vmatpush.bf16.msrb.mxu1 %v5123_v9  ;;  %3150 = vmatmul.bf16.vlgmr.msra.gmra.mxu2 %v3540_v21  ;;  %v5162_v9 = vld [vmem:[%s6532_s1 + $0x8b0] sm:$0xff]  ;;  %v5159_v21 = vld [vmem:[%s6532_s1 + $0x898] sm:$0xff] }
  0xe4   :  { %3198 = vmatpush.bf16.msrb.mxu2 %v5131_v14  ;;  %3164 = vmatmul.bf16.vlgmr.msra.gmra.mxu3 %v3544_v24  ;;  %v5169_v14 = vld [vmem:[%s6532_s1 + $0x8e8] sm:$0xff]  ;;  %v5142_v23 = vld [vmem:[%s6532_s1 + $0x810] sm:$0xff] }
  0xe5   :  { %3212 = vmatpush.bf16.msrb.mxu3 %v5139_v22  ;;  %v5167_v22 = vld [vmem:[%s6532_s1 + $0x8d8] sm:$0xff]  ;;  %v5150_v24 = vld [vmem:[%s6532_s1 + $0x850] sm:$0xff] }
  0xe6   :  { %3171 = vmatpush.bf16.msrb.mxu0 %v5114_v25  ;;  %v5158_v25 = vld [vmem:[%s6532_s1 + $0x890] sm:$0xff] }
  0xe7   :  { %3185 = vmatpush.bf16.msrb.mxu1 %v5122_v26  ;;  %v5166_v26 = vld [vmem:[%s6532_s1 + $0x8d0] sm:$0xff] }
  0xe8   :  { %3199 = vmatpush.bf16.msrb.mxu2 %v5130_v27  ;;  %v691_v27 = vld [vmem:[%s6532_s1 + $0x9c0] sm:$0xf] }
  0xe9   :  { %3213 = vmatpush.bf16.msrb.mxu3 %v5138_v28  ;;  %v5141_v28 = vld [vmem:[%s6532_s1 + $0x808] sm:$0xff] }
  0xea   :  { %3172 = vmatpush.bf16.msrb.mxu0 %v5113_v29  ;;  %v5149_v29 = vld [vmem:[%s6532_s1 + $0x848] sm:$0xff] }
  0xeb   :  { %3186 = vmatpush.bf16.msrb.mxu1 %v5121_v30  ;;  %v5157_v30 = vld [vmem:[%s6532_s1 + $0x888] sm:$0xff] }
  0xec   :  { %3200 = vmatpush.bf16.msrb.mxu2 %v5129_v31  ;;  %v5165_v31 = vld [vmem:[%s6532_s1 + $0x8c8] sm:$0xff] }
  0xed   :  { %3214 = vmatpush.bf16.msrb.mxu3 %v5137_v32  ;;  %v2144_v32 = vunpack.c.l.b16 %v691_v27  ;;  %v2927_v27 = vpop.f32.mrf.mxu2 }
  0xee   :  { %3173 = vmatpush.bf16.msrb.mxu0 %v5112_v33  ;;  %v5140_v33 = vld [vmem:[%s6532_s1 + $0x800] sm:$0xff] }
  0xef   :  { %3187 = vmatpush.bf16.msrb.mxu1 %v5120_v34  ;;  %v5148_v34 = vld [vmem:[%s6532_s1 + $0x840] sm:$0xff] }
  0xf0   :  { %3201 = vmatpush.bf16.msrb.mxu2 %v5128_v35  ;;  %v5156_v35 = vld [vmem:[%s6532_s1 + $0x880] sm:$0xff] }
  0xf1   :  { %3215 = vmatpush.bf16.msrb.mxu3 %v5136_v36  ;;  %v5179_v36 = vld [vmem:[%s6532_s1 + $0x938] sm:$0xff] }
  0xf2   :  { %3174 = vmatpush.bf16.msrb.mxu0 %v5111_v37  ;;  %v5187_v37 = vld [vmem:[%s6532_s1 + $0x978] sm:$0xff] }
  0xf3   :  { %3188 = vmatpush.bf16.msrb.mxu1 %v5119_v38  ;;  %v3563_v38 = vld [vmem:[%s6533_s0 + $0x80] sm:$0xf] }
  0xf4   :  { %3202 = vmatpush.bf16.msrb.mxu2 %v5127_v39  ;;  %v4880_v39 = vld [vmem:[%s6533_s0 + $0x11c] sm:$0xf0] }
  0xf5   :  { %3216 = vmatpush.bf16.msrb.mxu3 %v5135_v40  ;;  %v3571_v40 = vld [vmem:[%s6533_s0 + $0x88] sm:$0xf] }
  0xf6   :  { %3175 = vmatpush.bf16.msrb.mxu0 %v5110_v41  ;;  %v4881_v41 = vld [vmem:[%s6533_s0 + $0x124] sm:$0xf0] }
  0xf7   :  { %3189 = vmatpush.bf16.msrb.mxu1 %v5118_v42  ;;  %v5195_v42 = vld [vmem:[%s6532_s1 + $0x9b8] sm:$0xff] }
  0xf8   :  { %3203 = vmatpush.bf16.msrb.mxu2 %v5126_v43  ;;  %v4860_v43 = vld [vmem:[%s6533_s0 + $0x84] sm:$0xf] }
  0xf9   :  { %3217 = vmatpush.bf16.msrb.mxu3 %v5134_v44  ;;  %v3565_v44 = vld [vmem:[%s6533_s0 + $0x120] sm:$0xf0] }
  0xfa   :  { %3176 = vmatpush.bf16.msrb.mxu0 %v5109_v45  ;;  %v2457_v45 = vpack.c.b16 %v2144_v32, %v2144_v32 }
  0xfb   :  { %3190 = vmatpush.bf16.msrb.mxu1 %v5117_v46  ;;  %v5164_v46 = vld [vmem:[%s6532_s1 + $0x8c0] sm:$0xff] }
  0xfc   :  { %3204 = vmatpush.bf16.msrb.mxu2 %v5125_v47  ;;  %v4861_v47 = vld [vmem:[%s6533_s0 + $0x8c] sm:$0xf]  ;;  %v2776_v55 = vsel %vm2774_vm0, %v2457_v45, 0 }
  0xfd   :  { %3218 = vmatpush.bf16.msrb.mxu3 %v5133_v48  ;;  %v3573_v48 = vld [vmem:[%s6533_s0 + $0x128] sm:$0xf0] }
  0xfe   :  { %3177 = vmatpush.bf16.msrb.mxu0 %v5108_v49  ;;  %v3564_v49 = vor.u32 %v4880_v39, %v3563_v38 }
  0xff   :  { %3191 = vmatpush.bf16.msrb.mxu1 %v5116_v50  ;;  %v3572_v50 = vor.u32 %v4881_v41, %v3571_v40 }
 0x100   :  { %3205 = vmatpush.bf16.msrb.mxu2 %v5124_v51  ;;  %v3568_v51 = vor.u32 %v4860_v43, %v3565_v44 }
 0x101   :  { %3219 = vmatpush.bf16.msrb.mxu3 %v5132_v62  ;;  %3178 = vmatmul.bf16.vlgmr.msrb.gmra.mxu0 %v3548_v1  ;;  %v5184_v62 = vld [vmem:[%s6532_s1 + $0x960] sm:$0xff]  ;;  %v5183_v1 = vld [vmem:[%s6532_s1 + $0x958] sm:$0xff] }
 0x102   :  { %3226 = vmatpush.bf16.msra.mxu0 %v5147_v52  ;;  %3192 = vmatmul.bf16.vlgmr.msrb.gmra.mxu1 %v3552_v4  ;;  %v3576_v52 = vor.u32 %v4861_v47, %v3573_v48  ;;  %v3589_v4 = vld [vmem:[%s6533_s0 + $0x138] sm:$0xf0] }
 0x103   :  { %3240 = vmatpush.bf16.msra.mxu1 %v5155_v53  ;;  %3206 = vmatmul.bf16.vlgmr.msrb.gmra.mxu2 %v3556_v2  ;;  %v5178_v53 = vld [vmem:[%s6532_s1 + $0x930] sm:$0xff]  ;;  %v5191_v2 = vld [vmem:[%s6532_s1 + $0x998] sm:$0xff] }
 0x104   :  { %3254 = vmatpush.bf16.msra.mxu2 %v5163_v59  ;;  %3220 = vmatmul.bf16.vlgmr.msrb.gmra.mxu3 %v3560_v5  ;;  %v5185_v59 = vld [vmem:[%s6532_s1 + $0x968] sm:$0xff]  ;;  %v5174_v5 = vld [vmem:[%s6532_s1 + $0x910] sm:$0xff] }
 0x105   :  { %3268 = vmatpush.bf16.msra.mxu3 %v5171_v3  ;;  %v4863_v3 = vld [vmem:[%s6533_s0 + $0x9c] sm:$0xf] }
 0x106   :  { %3227 = vmatpush.bf16.msra.mxu0 %v5146_v6  ;;  %v3592_v6 = vor.u32 %v4863_v3, %v3589_v4 }
 0x107   :  { %3241 = vmatpush.bf16.msra.mxu1 %v5154_v8  ;;  %v5182_v8 = vld [vmem:[%s6532_s1 + $0x950] sm:$0xff] }
 0x108   :  { %3255 = vmatpush.bf16.msra.mxu2 %v5162_v9  ;;  %v5190_v9 = vld [vmem:[%s6532_s1 + $0x990] sm:$0xff] }
 0x109   :  { %3269 = vmatpush.bf16.msra.mxu3 %v5170_v10  ;;  %v5173_v10 = vld [vmem:[%s6532_s1 + $0x908] sm:$0xff] }
 0x10a   :  { %3228 = vmatpush.bf16.msra.mxu0 %v5145_v11  ;;  %v5181_v11 = vld [vmem:[%s6532_s1 + $0x948] sm:$0xff] }
 0x10b   :  { %3242 = vmatpush.bf16.msra.mxu1 %v5153_v12  ;;  %v5189_v12 = vld [vmem:[%s6532_s1 + $0x988] sm:$0xff] }
 0x10c   :  { %3256 = vmatpush.bf16.msra.mxu2 %v5161_v13  ;;  %v5172_v13 = vld [vmem:[%s6532_s1 + $0x900] sm:$0xff] }
 0x10d   :  { %3270 = vmatpush.bf16.msra.mxu3 %v5169_v14  ;;  %v5180_v14 = vld [vmem:[%s6532_s1 + $0x940] sm:$0xff] }
 0x10e   :  { %3229 = vmatpush.bf16.msra.mxu0 %v5144_v15  ;;  %v5188_v15 = vld [vmem:[%s6532_s1 + $0x980] sm:$0xff] }
 0x10f   :  { %3243 = vmatpush.bf16.msra.mxu1 %v5152_v16  ;;  %v3579_v16 = vld [vmem:[%s6533_s0 + $0x90] sm:$0xf] }
 0x110   :  { %3257 = vmatpush.bf16.msra.mxu2 %v5160_v17  ;;  %v4882_v17 = vld [vmem:[%s6533_s0 + $0x12c] sm:$0xf0] }
 0x111   :  { %3271 = vmatpush.bf16.msra.mxu3 %v5168_v18  ;;  %v4862_v18 = vld [vmem:[%s6533_s0 + $0x94] sm:$0xf] }
 0x112   :  { %3230 = vmatpush.bf16.msra.mxu0 %v5143_v19  ;;  %v3581_v19 = vld [vmem:[%s6533_s0 + $0x130] sm:$0xf0] }
 0x113   :  { %3244 = vmatpush.bf16.msra.mxu1 %v5151_v20  ;;  %v3587_v20 = vld [vmem:[%s6533_s0 + $0x98] sm:$0xf] }
 0x114   :  { %3258 = vmatpush.bf16.msra.mxu2 %v5159_v21  ;;  %v4883_v21 = vld [vmem:[%s6533_s0 + $0x134] sm:$0xf0] }
 0x115   :  { %3272 = vmatpush.bf16.msra.mxu3 %v5167_v22  ;;  %v3580_v22 = vor.u32 %v4882_v17, %v3579_v16 }
 0x116   :  { %3231 = vmatpush.bf16.msra.mxu0 %v5142_v23  ;;  %v3584_v23 = vor.u32 %v4862_v18, %v3581_v19 }
 0x117   :  { %3245 = vmatpush.bf16.msra.mxu1 %v5150_v24  ;;  %v3588_v24 = vor.u32 %v4883_v21, %v3587_v20 }
 0x118   :  { %3259 = vmatpush.bf16.msra.mxu2 %v5158_v25  ;;  %v2899_v25 = vpop.f32.mrf.mxu0 }
 0x119   :  { %3273 = vmatpush.bf16.msra.mxu3 %v5166_v26  ;;  %v2913_v26 = vpop.f32.mrf.mxu1  ;;  %v2900_v45 = vadd.f32 %v2899_v25, %v6041_v54 }
 0x11a   :  { %3232 = vmatpush.bf16.msra.mxu0 %v5141_v28  ;;  %v2941_v28 = vpop.f32.mrf.mxu3 }
 0x11b   :  { %3246 = vmatpush.bf16.msra.mxu1 %v5149_v29  ;;  %v2914_v47 = vadd.f32 %v2913_v26, %v2900_v45 }
 0x11c   :  { %3260 = vmatpush.bf16.msra.mxu2 %v5157_v30 }
 0x11d   :  { %3274 = vmatpush.bf16.msra.mxu3 %v5165_v31  ;;  %v2929_v31 = vpop.f32.mrf.mxu2 }
 0x11e   :  { %3233 = vmatpush.bf16.msra.mxu0 %v5140_v33 }
 0x11f   :  { %3247 = vmatpush.bf16.msra.mxu1 %v5148_v34 }
 0x120   :  { %3261 = vmatpush.bf16.msra.mxu2 %v5156_v35  ;;  %v2901_v29 = vpop.f32.mrf.mxu0 }
 0x121   :  { %3275 = vmatpush.bf16.msra.mxu3 %v5164_v46  ;;  %3234 = vmatmul.bf16.vlgmr.msra.gmra.mxu0 %v3564_v49  ;;  %v2915_v30 = vpop.f32.mrf.mxu1  ;;  %v2928_v49 = vadd.f32 %v2927_v27, %v2914_v47 }
 0x122   :  { %3282 = vmatpush.bf16.msrb.mxu0 %v5179_v36  ;;  %3248 = vmatmul.bf16.vlgmr.msra.gmra.mxu1 %v3568_v51  ;;  %v2943_v32 = vpop.f32.mrf.mxu3 }
 0x123   :  { %3296 = vmatpush.bf16.msrb.mxu1 %v5187_v37  ;;  %3262 = vmatmul.bf16.vlgmr.msra.gmra.mxu2 %v3572_v50  ;;  %v2902_v50 = vadd.f32 %v2901_v29, %v6076_v7 }
 0x124   :  { %3310 = vmatpush.bf16.msrb.mxu2 %v5195_v42  ;;  %3276 = vmatmul.bf16.vlgmr.msra.gmra.mxu3 %v3576_v52 }
 0x125   :  { %3331 = vmatpush.bf16.msrb.mxu3 %v2776_v55  ;;  %v2983_v35 = vpop.f32.mrf.mxu2 }
 0x126   :  { %3283 = vmatpush.bf16.msrb.mxu0 %v5178_v53  ;;  %v2942_v53 = vadd.f32 %v2941_v28, %v2928_v49 }
 0x127   :  { %3297 = vmatpush.bf16.msrb.mxu1 %v5186_v56  ;;  %v2916_v56 = vadd.f32 %v2915_v30, %v2902_v50 }
 0x128   :  { %3311 = vmatpush.bf16.msrb.mxu2 %v5194_v57  ;;  %v2955_v33 = vpop.f32.mrf.mxu0 }
 0x129   :  { %v2969_v34 = vpop.f32.mrf.mxu1  ;;  %v2956_v57 = vadd.f32 %v2955_v33, %v2942_v53 }
 0x12a   :  { %3284 = vmatpush.bf16.msrb.mxu0 %v5177_v58  ;;  %v2997_v36 = vpop.f32.mrf.mxu3 }
 0x12b   :  { %3298 = vmatpush.bf16.msrb.mxu1 %v5185_v59  ;;  %v2930_v59 = vadd.f32 %v2929_v31, %v2916_v56 }
 0x12c   :  { %3312 = vmatpush.bf16.msrb.mxu2 %v5193_v60  ;;  %v2970_v60 = vadd.f32 %v2969_v34, %v2956_v57 }
 0x12d   :  { %v2985_v39 = vpop.f32.mrf.mxu2 }
 0x12e   :  { %3285 = vmatpush.bf16.msrb.mxu0 %v5176_v61 }
 0x12f   :  { %3299 = vmatpush.bf16.msrb.mxu1 %v5184_v62 }
 0x130   :  { %3313 = vmatpush.bf16.msrb.mxu2 %v5192_v63  ;;  %v2957_v37 = vpop.f32.mrf.mxu0  ;;  %v2944_v63 = vadd.f32 %v2943_v32, %v2930_v59 }
 0x131   :  { %v2971_v38 = vpop.f32.mrf.mxu1 }
 0x132   :  { %3286 = vmatpush.bf16.msrb.mxu0 %v5175_v0  ;;  %v2999_v40 = vpop.f32.mrf.mxu3  ;;  %v2984_v0 = vadd.f32 %v2983_v35, %v2970_v60  ;;  %v2958_v54 = vadd.f32 %v2957_v37, %v2944_v63 }
 0x133   :  { %3300 = vmatpush.bf16.msrb.mxu1 %v5183_v1 }
 0x134   :  { %3314 = vmatpush.bf16.msrb.mxu2 %v5191_v2  ;;  %4841 = vmatmul.msk.bf16.vlgmr.msrb.gmra.mxu3 %vm2770_vm1, %v3592_v6  ;;  %v2998_v2 = vadd.f32 %v2997_v36, %v2984_v0  ;;  %v2972_v4 = vadd.f32 %v2971_v38, %v2958_v54  ;;  %v3345_v38 = vld [vmem:[%s6536_s3 + $0x28] sm:$0xff] }
 0x135   :  { %v3039_v43 = vpop.f32.mrf.mxu2 }
 0x136   :  { %3287 = vmatpush.bf16.msrb.mxu0 %v5174_v5  ;;  %v2986_v7 = vadd.f32 %v2985_v39, %v2972_v4  ;;  %v3399_v4 = vld [vmem:[%s6537_s5 + $0x78] sm:$0xff] }
 0x137   :  { %3301 = vmatpush.bf16.msrb.mxu1 %v5182_v8 }
 0x138   :  { %3315 = vmatpush.bf16.msrb.mxu2 %v5190_v9  ;;  %v3011_v41 = vpop.f32.mrf.mxu0 }
 0x139   :  { %v3025_v42 = vpop.f32.mrf.mxu1  ;;  %v3012_v5 = vadd.f32 %v3011_v41, %v2998_v2  ;;  %v3344_v41 = vld [vmem:[%s6536_s3 + $0x20] sm:$0xff] }
 0x13a   :  { %3288 = vmatpush.bf16.msrb.mxu0 %v5173_v10  ;;  %v3053_v44 = vpop.f32.mrf.mxu3 }
 0x13b   :  { %3302 = vmatpush.bf16.msrb.mxu1 %v5181_v11  ;;  %v3026_v9 = vadd.f32 %v3025_v42, %v3012_v5  ;;  %v3000_v11 = vadd.f32 %v2999_v40, %v2986_v7  ;;  %v3398_v5 = vld [vmem:[%s6537_s5 + $0x70] sm:$0xff] }
 0x13c   :  { %3316 = vmatpush.bf16.msrb.mxu2 %v5189_v12 }
 0x13d   :  { %v3041_v51 = vpop.f32.mrf.mxu2  ;;  %v3040_v12 = vadd.f32 %v3039_v43, %v3026_v9 }
 0x13e   :  { %3289 = vmatpush.bf16.msrb.mxu0 %v5172_v13 }
 0x13f   :  { %3303 = vmatpush.bf16.msrb.mxu1 %v5180_v14 }
 0x140   :  { %3317 = vmatpush.bf16.msrb.mxu2 %v5188_v15  ;;  %v3013_v46 = vpop.f32.mrf.mxu0  ;;  %v3054_v15 = vadd.f32 %v3053_v44, %v3040_v12  ;;  %v3343_v44 = vld [vmem:[%s6536_s3 + $0x18] sm:$0xff] }
 0x141   :  { %3290 = vmatmul.bf16.vlgmr.msrb.gmra.mxu0 %v3580_v22  ;;  %v3027_v48 = vpop.f32.mrf.mxu1  ;;  %v3014_v14 = vadd.f32 %v3013_v46, %v3000_v11  ;;  %v3347_v22 = vld [vmem:[%s6536_s3 + $0x38] sm:$0xff] }
 0x142   :  { %3304 = vmatmul.bf16.vlgmr.msrb.gmra.mxu1 %v3584_v23  ;;  %v3055_v52 = vpop.f32.mrf.mxu3  ;;  %v3346_v23 = vld [vmem:[%s6536_s3 + $0x30] sm:$0xff]  ;;  %3367 = vmatpush.msra.mxu3 %v3347_v22 }
 0x143   :  { %3318 = vmatmul.bf16.vlgmr.msrb.gmra.mxu2 %v3588_v24  ;;  %v3028_v18 = vadd.f32 %v3027_v48, %v3014_v14  ;;  %v3342_v48 = vld [vmem:[%s6536_s3 + $0x10] sm:$0xff]  ;;  %3404 = vmatpush.msra.mxu0 %v3399_v4  ;;  %v3395_v14 = vld [vmem:[%s6537_s5 + $0x58] sm:$0xff] }
 0x144   :  { %3368 = vmatpush.msra.mxu3 %v3346_v23  ;;  %5196 = vmatpush.msra.mxu1 %v3399_v4 }
 0x145   :  { %v3042_v20 = vadd.f32 %v3041_v51, %v3028_v18  ;;  %3405 = vmatpush.msra.mxu0 %v3398_v5 }
 0x146   :  { %v3095_v61 = vpop.f32.mrf.mxu2  ;;  %3369 = vmatpush.msra.mxu3 %v3345_v38  ;;  %5197 = vmatpush.msra.mxu1 %v3398_v5  ;;  %v3388_v38 = vld [vmem:[%s6537_s5 + $0x20] sm:$0xff] }
 0x147   :  { %v3056_v26 = vadd.f32 %v3055_v52, %v3042_v20  ;;  %v3341_v52 = vld [vmem:[%s6536_s3 + $0x8] sm:$0xff] }
 0x148   :  { %v3067_v55 = vpop.f32.mrf.mxu0  ;;  %3370 = vmatpush.msra.mxu3 %v3344_v41 }
 0x149   :  { %v3081_v58 = vpop.f32.mrf.mxu1  ;;  %v3068_v19 = vadd.f32 %v3067_v55, %v3054_v15  ;;  %v3340_v55 = vld [vmem:[%s6536_s3] sm:$0xff] }
 0x14a   :  { %v3109_v62 = vpop.f32.mrf.mxu3  ;;  %3371 = vmatpush.msra.mxu3 %v3343_v44 }
 0x14b   :  { %v3082_v24 = vadd.f32 %v3081_v58, %v3068_v19 }
 0x14c   :  { %3372 = vmatpush.msra.mxu3 %v3342_v48  ;;  %v3386_v48 = vld [vmem:[%s6537_s5 + $0x10] sm:$0xff] }
 0x14d   :  { %v3096_v27 = vadd.f32 %v3095_v61, %v3082_v24  ;;  %v3392_v24 = vld [vmem:[%s6537_s5 + $0x40] sm:$0xff] }
 0x14e   :  { %v3097_v6 = vpop.f32.mrf.mxu2  ;;  %3373 = vmatpush.msra.mxu3 %v3341_v52 }
 0x14f   :  { %v3110_v31 = vadd.f32 %v3109_v62, %v3096_v27  ;;  %v3391_v27 = vld [vmem:[%s6537_s5 + $0x38] sm:$0xff] }
 0x150   :  { %v3069_v1 = vpop.f32.mrf.mxu0  ;;  %3374 = vmatpush.msra.mxu3 %v3340_v55 }
 0x151   :  { %v3083_v3 = vpop.f32.mrf.mxu1  ;;  %v3070_v28 = vadd.f32 %v3069_v1, %v3056_v26 }
 0x152   :  { %v3111_v8 = vpop.f32.mrf.mxu3 }
 0x153   :  { %v3084_v33 = vadd.f32 %v3083_v3, %v3070_v28 }
 0x155   :  { %v3098_v36 = vadd.f32 %v3097_v6, %v3084_v33 }
 0x157   :  { %v3112_v42 = vadd.f32 %v3111_v8, %v3098_v36  ;;  %v3397_v8 = vld [vmem:[%s6537_s5 + $0x68] sm:$0xff] }
 0x158   :  { %3406 = vmatpush.msra.mxu0 %v3397_v8  ;;  %5198 = vmatpush.msra.mxu1 %v3397_v8 }
 0x15e   :  { %v3123_v10 = vpop.f32.mrf.mxu0 }
 0x15f   :  { %v3137_v13 = vpop.f32.mrf.mxu1  ;;  %v3124_v34 = vadd.f32 %v3123_v10, %v3110_v31  ;;  %v3396_v10 = vld [vmem:[%s6537_s5 + $0x60] sm:$0xff] }
 0x160   :  { %3407 = vmatpush.msra.mxu0 %v3396_v10  ;;  %5199 = vmatpush.msra.mxu1 %v3396_v10 }
 0x161   :  { %v3138_v37 = vadd.f32 %v3137_v13, %v3124_v34 }
 0x162   :  { %3408 = vmatpush.msra.mxu0 %v3395_v14  ;;  %5200 = vmatpush.msra.mxu1 %v3395_v14 }
 0x166   :  { %v3151_v16 = vpop.f32.mrf.mxu2  ;;  %v3125_v21 = vpop.f32.mrf.mxu0 }
 0x167   :  { %v3165_v17 = vpop.f32.mrf.mxu3  ;;  %v3139_v25 = vpop.f32.mrf.mxu1  ;;  %v3152_v43 = vadd.f32 %v3151_v16, %v3138_v37  ;;  %v3126_v45 = vadd.f32 %v3125_v21, %v3112_v42  ;;  %v3394_v16 = vld [vmem:[%s6537_s5 + $0x50] sm:$0xff]  ;;  %v3393_v21 = vld [vmem:[%s6537_s5 + $0x48] sm:$0xff] }
 0x168   :  { %3409 = vmatpush.msra.mxu0 %v3394_v16  ;;  %5201 = vmatpush.msra.mxu1 %v3394_v16 }
 0x169   :  { %v3166_v47 = vadd.f32 %v3165_v17, %v3152_v43  ;;  %v3140_v50 = vadd.f32 %v3139_v25, %v3126_v45 }
 0x16a   :  { %3410 = vmatpush.msra.mxu0 %v3393_v21  ;;  %5202 = vmatpush.msra.mxu1 %v3393_v21 }
 0x16c   :  { %3411 = vmatpush.msra.mxu0 %v3392_v24  ;;  %5203 = vmatpush.msra.mxu1 %v3392_v24 }
 0x16e   :  { %v3153_v29 = vpop.f32.mrf.mxu2  ;;  %3412 = vmatpush.msra.mxu0 %v3391_v27  ;;  %5204 = vmatpush.msra.mxu1 %v3391_v27 }
 0x16f   :  { %v3167_v30 = vpop.f32.mrf.mxu3  ;;  %v3154_v53 = vadd.f32 %v3153_v29, %v3140_v50  ;;  %v3390_v29 = vld [vmem:[%s6537_s5 + $0x30] sm:$0xff]  ;;  %v3384_v50 = vld [vmem:[%s6537_s5] sm:$0xff] }
 0x170   :  { %3413 = vmatpush.msra.mxu0 %v3390_v29  ;;  %5205 = vmatpush.msra.mxu1 %v3390_v29 }
 0x171   :  { %v3168_v60 = vadd.f32 %v3167_v30, %v3154_v53 }
 0x17e   :  { %v3179_v32 = vpop.f32.mrf.mxu0 }
 0x17f   :  { %v3193_v35 = vpop.f32.mrf.mxu1  ;;  %v3180_v51 = vadd.f32 %v3179_v32, %v3166_v47 }
 0x181   :  { %v3194_v58 = vadd.f32 %v3193_v35, %v3180_v51  ;;  %v3389_v35 = vld [vmem:[%s6537_s5 + $0x28] sm:$0xff]  ;;  %v5213_v51 = vld [vmem:[%s6535_s4] ss:$0 sm:$0xff] }
 0x182   :  { %3414 = vmatpush.msra.mxu0 %v3389_v35  ;;  %5206 = vmatpush.msra.mxu1 %v3389_v35 }
 0x184   :  { %3415 = vmatpush.msra.mxu0 %v3388_v38  ;;  %5207 = vmatpush.msra.mxu1 %v3388_v38 }
 0x186   :  { %v3207_v39 = vpop.f32.mrf.mxu2  ;;  %v3181_v46 = vpop.f32.mrf.mxu0 }
 0x187   :  { %v3221_v40 = vpop.f32.mrf.mxu3  ;;  %v3195_v49 = vpop.f32.mrf.mxu1  ;;  %v3208_v61 = vadd.f32 %v3207_v39, %v3194_v58  ;;  %v3182_v63 = vadd.f32 %v3181_v46, %v3168_v60 }
 0x189   :  { %v3222_v0 = vadd.f32 %v3221_v40, %v3208_v61  ;;  %v3196_v2 = vadd.f32 %v3195_v49, %v3182_v63  ;;  %v3387_v40 = vld [vmem:[%s6537_s5 + $0x18] sm:$0xff]  ;;  %v3385_v49 = vld [vmem:[%s6537_s5 + $0x8] sm:$0xff] }
 0x18a   :  { %3416 = vmatpush.msra.mxu0 %v3387_v40  ;;  %5208 = vmatpush.msra.mxu1 %v3387_v40 }
 0x18c   :  { %3417 = vmatpush.msra.mxu0 %v3386_v48  ;;  %5209 = vmatpush.msra.mxu1 %v3386_v48 }
 0x18e   :  { %v3209_v56 = vpop.f32.mrf.mxu2  ;;  %3418 = vmatpush.msra.mxu0 %v3385_v49  ;;  %5210 = vmatpush.msra.mxu1 %v3385_v49 }
 0x18f   :  { %v3223_v57 = vpop.f32.mrf.mxu3  ;;  %v3210_v7 = vadd.f32 %v3209_v56, %v3196_v2 }
 0x190   :  { %3419 = vmatpush.msra.mxu0 %v3384_v50  ;;  %5211 = vmatpush.msra.mxu1 %v3384_v50 }
 0x191   :  { %v3224_v12 = vadd.f32 %v3223_v57, %v3210_v7 }
 0x19e   :  { %v3235_v59 = vpop.f32.mrf.mxu0 }
 0x19f   :  { %v3249_v62 = vpop.f32.mrf.mxu1  ;;  %v3236_v3 = vadd.f32 %v3235_v59, %v3222_v0  ;;  %v5214_v59 = vld [vmem:[%s6538_s6] ss:$0 sm:$0xff] }
 0x1a1   :  { %v3250_v9 = vadd.f32 %v3249_v62, %v3236_v3 }
 0x1a6   :  { %v3263_v54 = vpop.f32.mrf.mxu2  ;;  %v3237_v6 = vpop.f32.mrf.mxu0 }
 0x1a7   :  { %v3277_v1 = vpop.f32.mrf.mxu3  ;;  %v3251_v11 = vpop.f32.mrf.mxu1  ;;  %v3264_v13 = vadd.f32 %v3263_v54, %v3250_v9  ;;  %v3238_v15 = vadd.f32 %v3237_v6, %v3224_v12 }
 0x1a9   :  { %v3278_v19 = vadd.f32 %v3277_v1, %v3264_v13  ;;  %v3252_v22 = vadd.f32 %v3251_v11, %v3238_v15 }
 0x1ae   :  { %v3265_v17 = vpop.f32.mrf.mxu2 }
 0x1af   :  { %v3279_v18 = vpop.f32.mrf.mxu3  ;;  %v3266_v26 = vadd.f32 %v3265_v17, %v3252_v22 }
 0x1b1   :  { %v3280_v32 = vadd.f32 %v3279_v18, %v3266_v26 }
 0x1b7   :  { %v3333_v30 = vpop.f32.mrf.mxu3 }
 0x1be   :  { %v3291_v20 = vpop.f32.mrf.mxu0 }
 0x1bf   :  { %v3292_v23 = vadd.f32 %v3291_v20, %v3278_v19  ;;  %v3305_v25 = vpop.f32.mrf.mxu1  ;;  %v3335_v45 = vpop.f32.mrf.mxu3 }
 0x1c1   :  { %v3306_v28 = vadd.f32 %v3305_v25, %v3292_v23 }
 0x1c6   :  { %v3319_v31 = vpop.f32.mrf.mxu2  ;;  %v3293_v34 = vpop.f32.mrf.mxu0 }
 0x1c7   :  { %v3320_v33 = vadd.f32 %v3319_v31, %v3306_v28  ;;  %v3294_v37 = vadd.f32 %v3293_v34, %v3280_v32  ;;  %v3307_v41 = vpop.f32.mrf.mxu1 }
 0x1c9   :  { %v3334_v36 = vadd.f32 %v3333_v30, %v3320_v33  ;;  %v3308_v42 = vadd.f32 %v3307_v41, %v3294_v37 }
 0x1cb   :  { %v3338_v39 = vmax.f32 %v3334_v36, 0.0 }
 0x1cd   :  { %4842 = vmatmul.msk.f32.vlgmr.msra.gmra.mxu3 %vm3352_vm2, %v3338_v39 }
 0x1ce   :  { %v3321_v43 = vpop.f32.mrf.mxu2 }
 0x1cf   :  { %v3322_v44 = vadd.f32 %v3321_v43, %v3308_v42 }
 0x1d1   :  { %v3336_v46 = vadd.f32 %v3335_v45, %v3322_v44 }
 0x1d3   :  { %v3339_v47 = vmax.f32 %v3336_v46, 0.0 }
 0x1d5   :  { %4843 = vmatmul.msk.f32.gmra.mxu3 %vm3352_vm2, %v3339_v47 }
 0x250   :  { %v3376_v52 = vpop.f32.mrf.mxu3 }
 0x251   :  { %v3377_v53 = vadd.f32 %v5213_v51, %v3376_v52 }
 0x253   :  { %v3382_v55 = vmax.f32 %v3377_v53, 0.0 }
 0x255   :  { %3420 = vmatmul.f32.vlgmr.msra.gmra.mxu0 %v3382_v55 }
 0x258   :  { %v3379_v56 = vpop.f32.mrf.mxu3 }
 0x259   :  { %v3380_v57 = vadd.f32 %v5213_v51, %v3379_v56 }
 0x25b   :  { %v3383_v58 = vmax.f32 %v3380_v57, 0.0 }
 0x25d   :  { %3423 = vmatmul.f32.vlgmr.msra.gmra.mxu1 %v3383_v58 }
 0x2d2   :  { %v3421_v60 = vpop.f32.mrf.mxu0 }
 0x2d3   :  { %v3422_v61 = vadd.f32 %v5214_v59, %v3421_v60 }
 0x2d5   :  { %3427 = vst [vmem:[%s6539_s7] sm:$0xff] %v3422_v61 }
 0x2da   :  { %v3424_v62 = vpop.f32.mrf.mxu1 }
 0x2db   :  { %v3425_v63 = vadd.f32 %v5214_v59, %v3424_v62 }
 0x2dd   :  { %3428 = vst [vmem:[%s6539_s7 + $0x8] sm:$0xff] %v3425_v63 }

</bundles_post_ra>
